<compile_context>
chip_gen: v5e
topology: v5e:2x2
jax: 0.10.0
libtpu: 0.0.40
codegen_flags: <defaults>
</compile_context>

<pallas_src>
import jax
import jax.numpy as jnp
from jax import lax
from jax.experimental import pallas as pl
from jax.experimental.pallas import tpu as pltpu


def _round_up(n, m):
    return ((n + m - 1) // m) * m


def rnn_kernel(x_ref,        # (T, Bp, D)  time-major, batch padded to 8, VMEM
               wih1_ref,     # (D, H)      W_ih_l0^T, VMEM
               b1_ref,       # (1, H)      b_ih_l0 + b_hh_l0, VMEM
               b2_ref,       # (1, H)      b_ih_l1 + b_hh_l1, VMEM
               bfc_ref,      # (1, Cp)     fc bias, lane-padded, VMEM
               whh_hbm_ref,  # (2H, 2H)    blockdiag(W_hh_l0^T, W_hh_l1^T), ANY
               wih2_hbm_ref, # (H, H)      W_ih_l1^T, ANY
               wfc_hbm_ref,  # (H, Cp)     W_fc^T lane-padded, ANY
               out_ref,      # (Bp, Cp)
               whh_vmem,     # scratch (2H, 2H)
               wih2_vmem,    # scratch (H, H)
               wfc_vmem,     # scratch (H, Cp)
               dma_sem):     # scratch DMA sems (3,)
    T, B, D = x_ref.shape
    H = wih1_ref.shape[1]

    # --- Kick off weight DMAs so they overlap the hoisted input projection.
    whh_cp = pltpu.make_async_copy(whh_hbm_ref, whh_vmem, dma_sem.at[0])
    wih2_cp = pltpu.make_async_copy(wih2_hbm_ref, wih2_vmem, dma_sem.at[1])
    wfc_cp = pltpu.make_async_copy(wfc_hbm_ref, wfc_vmem, dma_sem.at[2])
    whh_cp.start()
    wih2_cp.start()
    wfc_cp.start()

    wih1 = wih1_ref[...]
    b1 = b1_ref[...]
    b2 = b2_ref[...]

    # --- Split hoisted layer-1 input projection:
    # small dot that gates step 0 only ...
    xw1_0 = jnp.dot(x_ref[0], wih1,
                    precision=lax.Precision.DEFAULT,
                    preferred_element_type=jnp.float32) + b1
    # ... and one batched MXU matmul for the remaining steps (overlaps the
    # latency-bound recurrence).
    x_rest = x_ref[pl.ds(1, T - 1)].reshape((T - 1) * B, D)
    xw1_rest = (jnp.dot(x_rest, wih1,
                        precision=lax.Precision.DEFAULT,
                        preferred_element_type=jnp.float32)
                + b1).reshape(T - 1, B, H)

    # Recurrent weights are needed from step 0 onwards.
    whh_cp.wait()
    wih2_cp.wait()

    # --- Sequential recurrence; hidden states carried in vregs.
    h1 = jnp.zeros((B, H), jnp.float32)
    h2 = jnp.zeros((B, H), jnp.float32)
    for t in range(T):  # T small & static -> fully unrolled, static slices
        xw_t = xw1_0 if t == 0 else xw1_rest[t - 1]
        # One fused block-diag matmul yields h1 @ Whh1 and h2 @ Whh2 together.
        hh = jnp.dot(jnp.concatenate([h1, h2], axis=-1), whh_vmem[...],
                     precision=lax.Precision.DEFAULT,
                     preferred_element_type=jnp.float32)
        h1 = jnp.tanh(xw_t + hh[:, :H])
        h2 = jnp.tanh(jnp.dot(h1, wih2_vmem[...],
                              precision=lax.Precision.DEFAULT,
                              preferred_element_type=jnp.float32)
                      + hh[:, H:] + b2)

    # --- fc head on the last hidden state; lane-dense (Bp, 128) store.
    wfc_cp.wait()
    out_ref[...] = (jnp.dot(h2, wfc_vmem[...],
                            precision=lax.Precision.DEFAULT,
                            preferred_element_type=jnp.float32)
                    + bfc_ref[...])


@jax.jit
def rnn_forward(x, params):
    """x: (B, T, D) float32 (batch_first). Returns (B, num_classes) float32."""
    B, T, D = x.shape
    H = params["wih1_t"].shape[1]
    C = params["bfc"].shape[1]        # unpadded num_classes
    Cp = params["wfc_p"].shape[1]     # lane-padded num_classes
    Bp = _round_up(B, 8)              # full sublane tile

    # Pad batch with zero rows and go time-major so each step slab is (Bp, D).
    x_p = jnp.zeros((Bp, T, D), jnp.float32).at[:B].set(x)
    x_tbd = jnp.transpose(x_p, (1, 0, 2))  # (T, Bp, D)

    vmem_spec = pl.BlockSpec(memory_space=pltpu.MemorySpace.VMEM)
    any_spec = pl.BlockSpec(memory_space=pl.ANY)

    out_p = pl.pallas_call(
        rnn_kernel,
        out_shape=jax.ShapeDtypeStruct((Bp, Cp), jnp.float32),
        in_specs=[vmem_spec,   # x
                  vmem_spec,   # wih1_t
                  vmem_spec,   # b1
                  vmem_spec,   # b2
                  vmem_spec,   # bfc_p
                  any_spec,    # whh_blk  (manual DMA)
                  any_spec,    # wih2_t   (manual DMA)
                  any_spec],   # wfc_p    (manual DMA)
        out_specs=vmem_spec,
        scratch_shapes=[
            pltpu.VMEM((2 * H, 2 * H), jnp.float32),
            pltpu.VMEM((H, H), jnp.float32),
            pltpu.VMEM((H, Cp), jnp.float32),
            pltpu.SemaphoreType.DMA((3,)),
        ],
    )(
        x_tbd,
        params["wih1_t"], params["b1"], params["b2"], params["bfc_p"],
        params["whh_blk"], params["wih2_t"], params["wfc_p"],
    )
    return out_p[:B, :C]


def make_params(key, input_size, hidden_size, num_classes):
    """Deterministic synthetic parameters with the shapes nn.RNN / nn.Linear use,
    pre-packed for the kernel (transposed, bias-folded, block-diag, lane-padded)."""
    D, H, C = input_size, hidden_size, num_classes
    ks = jax.random.split(key, 10)
    s = 0.1
    # PyTorch shapes: W_ih_l0 (H, D), W_hh_l* (H, H), biases (H,), fc (C, H).
    w_ih1 = jax.random.normal(ks[0], (H, D), jnp.float32) * s
    w_hh1 = jax.random.normal(ks[1], (H, H), jnp.float32) * s
    b_ih1 = jax.random.normal(ks[2], (H,), jnp.float32) * s
    b_hh1 = jax.random.normal(ks[3], (H,), jnp.float32) * s
    w_ih2 = jax.random.normal(ks[4], (H, H), jnp.float32) * s
    w_hh2 = jax.random.normal(ks[5], (H, H), jnp.float32) * s
    b_ih2 = jax.random.normal(ks[6], (H,), jnp.float32) * s
    b_hh2 = jax.random.normal(ks[7], (H,), jnp.float32) * s
    w_fc = jax.random.normal(ks[8], (C, H), jnp.float32) * s
    b_fc = jax.random.normal(ks[9], (C,), jnp.float32) * s

    # Block-diagonal fused recurrent weight (transposed layout).
    whh_blk = (jnp.zeros((2 * H, 2 * H), jnp.float32)
               .at[:H, :H].set(w_hh1.T)
               .at[H:, H:].set(w_hh2.T))

    # Lane-padded fc head.
    Cp = _round_up(C, 128)
    wfc_p = jnp.zeros((H, Cp), jnp.float32).at[:, :C].set(w_fc.T)
    bfc_p = jnp.zeros((1, Cp), jnp.float32).at[:, :C].set(b_fc[None, :])

    return {
        # kernel-packed
        "wih1_t": w_ih1.T, "b1": (b_ih1 + b_hh1)[None, :],
        "whh_blk": whh_blk,
        "wih2_t": w_ih2.T, "b2": (b_ih2 + b_hh2)[None, :],
        "wfc_p": wfc_p, "bfc_p": bfc_p,
        # unpadded / per-layer copies for the pure-JAX reference
        "whh1_t": w_hh1.T, "whh2_t": w_hh2.T,
        "wfc_t": w_fc.T, "bfc": b_fc[None, :],
    }


def rnn_reference(x, params):
    """Pure-JAX reference of the PyTorch forward (2-layer tanh RNN + fc on last step)."""
    B, T, D = x.shape
    H = params["whh1_t"].shape[0]

    def step(carry, x_t):
        h1, h2 = carry
        h1 = jnp.tanh(x_t @ params["wih1_t"] + h1 @ params["whh1_t"] + params["b1"])
        h2 = jnp.tanh(h1 @ params["wih2_t"] + h2 @ params["whh2_t"] + params["b2"])
        return (h1, h2), None

    h0 = (jnp.zeros((B, H), jnp.float32), jnp.zeros((B, H), jnp.float32))
    (h1, h2), _ = lax.scan(step, h0, jnp.swapaxes(x, 0, 1))
    return h2 @ params["wfc_t"] + params["bfc"]


if __name__ == "__main__":
    batch, seq_len = 4, 8
    input_size, hidden_size, num_classes = 256, 128, 2

    key = jax.random.PRNGKey(0)
    k_x, k_p = jax.random.split(key)
    x = jax.random.normal(k_x, (batch, seq_len, input_size), jnp.float32)
    params = make_params(k_p, input_size, hidden_size, num_classes)

    out = jax.block_until_ready(rnn_forward(x, params))
    ref = jax.block_until_ready(rnn_reference(x, params))

    assert out.shape == (batch, num_classes)
    assert jnp.allclose(out, ref, atol=1e-4, rtol=1e-5), "mismatch vs pure-JAX reference"
    print("KERNEL_OK")
</pallas_src>

<mosaic_0001>
module attributes {stable_mosaic.version = 11 : i64} {
  func.func @rnn_kernel(%arg0: memref<8x8x256xf32, #tpu.memory_space<vmem>>, %arg1: memref<256x128xf32, #tpu.memory_space<vmem>>, %arg2: memref<1x128xf32, #tpu.memory_space<vmem>>, %arg3: memref<1x128xf32, #tpu.memory_space<vmem>>, %arg4: memref<1x128xf32, #tpu.memory_space<vmem>>, %arg5: memref<256x256xf32, #tpu.memory_space<any>>, %arg6: memref<128x128xf32, #tpu.memory_space<any>>, %arg7: memref<128x128xf32, #tpu.memory_space<any>>, %arg8: memref<8x128xf32, #tpu.memory_space<vmem>>, %arg9: memref<256x256xf32, #tpu.memory_space<vmem>>, %arg10: memref<128x128xf32, #tpu.memory_space<vmem>>, %arg11: memref<128x128xf32, #tpu.memory_space<vmem>>, %arg12: memref<3x!tpu.dma_semaphore, #tpu.memory_space<semaphore_mem>>) attributes {dimension_semantics = [], scalar_prefetch = 0 : i64, scratch_operands = 4 : i64, tpu.core_type = #tpu.core_type<tc>} {
    %c0_i32 = arith.constant 0 : i32
    %0 = tpu.memref_slice %arg12[%c0_i32] : memref<3x!tpu.dma_semaphore, #tpu.memory_space<semaphore_mem>> -> memref<1x!tpu.dma_semaphore, #tpu.memory_space<semaphore_mem>>
    %1 = tpu.memref_squeeze %0 : memref<1x!tpu.dma_semaphore, #tpu.memory_space<semaphore_mem>> -> memref<!tpu.dma_semaphore, #tpu.memory_space<semaphore_mem>>
    tpu.enqueue_dma source(%arg5 : memref<256x256xf32, #tpu.memory_space<any>>) target(%arg9 : memref<256x256xf32, #tpu.memory_space<vmem>>) target_semaphore(%1 : memref<!tpu.dma_semaphore, #tpu.memory_space<semaphore_mem>>)
    %c1_i32 = arith.constant 1 : i32
    %2 = tpu.memref_slice %arg12[%c1_i32] : memref<3x!tpu.dma_semaphore, #tpu.memory_space<semaphore_mem>> -> memref<1x!tpu.dma_semaphore, #tpu.memory_space<semaphore_mem>>
    %3 = tpu.memref_squeeze %2 : memref<1x!tpu.dma_semaphore, #tpu.memory_space<semaphore_mem>> -> memref<!tpu.dma_semaphore, #tpu.memory_space<semaphore_mem>>
    tpu.enqueue_dma source(%arg6 : memref<128x128xf32, #tpu.memory_space<any>>) target(%arg10 : memref<128x128xf32, #tpu.memory_space<vmem>>) target_semaphore(%3 : memref<!tpu.dma_semaphore, #tpu.memory_space<semaphore_mem>>)
    %c2_i32 = arith.constant 2 : i32
    %4 = tpu.memref_slice %arg12[%c2_i32] : memref<3x!tpu.dma_semaphore, #tpu.memory_space<semaphore_mem>> -> memref<1x!tpu.dma_semaphore, #tpu.memory_space<semaphore_mem>>
    %5 = tpu.memref_squeeze %4 : memref<1x!tpu.dma_semaphore, #tpu.memory_space<semaphore_mem>> -> memref<!tpu.dma_semaphore, #tpu.memory_space<semaphore_mem>>
    tpu.enqueue_dma source(%arg7 : memref<128x128xf32, #tpu.memory_space<any>>) target(%arg11 : memref<128x128xf32, #tpu.memory_space<vmem>>) target_semaphore(%5 : memref<!tpu.dma_semaphore, #tpu.memory_space<semaphore_mem>>)
    %c0 = arith.constant 0 : index
    %c0_0 = arith.constant 0 : index
    %6 = vector.load %arg1[%c0, %c0_0] : memref<256x128xf32, #tpu.memory_space<vmem>>, vector<256x128xf32>
    %c0_1 = arith.constant 0 : index
    %c0_2 = arith.constant 0 : index
    %7 = vector.load %arg2[%c0_1, %c0_2] : memref<1x128xf32, #tpu.memory_space<vmem>>, vector<1x128xf32>
    %c0_3 = arith.constant 0 : index
    %c0_4 = arith.constant 0 : index
    %8 = vector.load %arg3[%c0_3, %c0_4] : memref<1x128xf32, #tpu.memory_space<vmem>>, vector<1x128xf32>
    %c0_5 = arith.constant 0 : index
    %c0_6 = arith.constant 0 : index
    %c0_7 = arith.constant 0 : index
    %9 = vector.load %arg0[%c0_5, %c0_6, %c0_7] : memref<8x8x256xf32, #tpu.memory_space<vmem>>, vector<1x8x256xf32>
    %10 = vector.shape_cast %9 : vector<1x8x256xf32> to vector<8x256xf32>
    %cst = arith.constant dense<0.000000e+00> : vector<8x128xf32>
    %11 = tpu.matmul %10, %6, %cst {dimension_numbers = #tpu.dot_dimension_numbers<[1], [0], [0], [1], [0, 0, 1, 1], [], []>} : vector<8x256xf32>, vector<256x128xf32>, vector<8x128xf32> -> vector<8x128xf32>
    %12 = vector.broadcast %7 : vector<1x128xf32> to vector<8x128xf32>
    %13 = arith.addf %11, %12 : vector<8x128xf32>
    %c1 = arith.constant 1 : index
    %c0_8 = arith.constant 0 : index
    %c0_9 = arith.constant 0 : index
    %14 = vector.load %arg0[%c1, %c0_8, %c0_9] : memref<8x8x256xf32, #tpu.memory_space<vmem>>, vector<7x8x256xf32>
    %15 = vector.shape_cast %14 : vector<7x8x256xf32> to vector<56x256xf32>
    %cst_10 = arith.constant dense<0.000000e+00> : vector<56x128xf32>
    %16 = tpu.matmul %15, %6, %cst_10 {dimension_numbers = #tpu.dot_dimension_numbers<[1], [0], [0], [1], [0, 0, 1, 1], [], []>} : vector<56x256xf32>, vector<256x128xf32>, vector<56x128xf32> -> vector<56x128xf32>
    %17 = vector.broadcast %7 : vector<1x128xf32> to vector<56x128xf32>
    %18 = arith.addf %16, %17 : vector<56x128xf32>
    %19 = vector.shape_cast %18 : vector<56x128xf32> to vector<7x8x128xf32>
    %c0_i32_11 = arith.constant 0 : i32
    %20 = tpu.memref_slice %arg12[%c0_i32_11] : memref<3x!tpu.dma_semaphore, #tpu.memory_space<semaphore_mem>> -> memref<1x!tpu.dma_semaphore, #tpu.memory_space<semaphore_mem>>
    %21 = tpu.memref_squeeze %20 : memref<1x!tpu.dma_semaphore, #tpu.memory_space<semaphore_mem>> -> memref<!tpu.dma_semaphore, #tpu.memory_space<semaphore_mem>>
    tpu.wait_dma2 semaphore(%21 : memref<!tpu.dma_semaphore, #tpu.memory_space<semaphore_mem>>) src(%arg5 : memref<256x256xf32, #tpu.memory_space<any>>) dst(%arg9 : memref<256x256xf32, #tpu.memory_space<vmem>>)
    %c1_i32_12 = arith.constant 1 : i32
    %22 = tpu.memref_slice %arg12[%c1_i32_12] : memref<3x!tpu.dma_semaphore, #tpu.memory_space<semaphore_mem>> -> memref<1x!tpu.dma_semaphore, #tpu.memory_space<semaphore_mem>>
    %23 = tpu.memref_squeeze %22 : memref<1x!tpu.dma_semaphore, #tpu.memory_space<semaphore_mem>> -> memref<!tpu.dma_semaphore, #tpu.memory_space<semaphore_mem>>
    tpu.wait_dma2 semaphore(%23 : memref<!tpu.dma_semaphore, #tpu.memory_space<semaphore_mem>>) src(%arg6 : memref<128x128xf32, #tpu.memory_space<any>>) dst(%arg10 : memref<128x128xf32, #tpu.memory_space<vmem>>)
    %cst_13 = arith.constant 0.000000e+00 : f32
    %24 = vector.broadcast %cst_13 : f32 to vector<8x128xf32>
    %cst_14 = arith.constant 0.000000e+00 : f32
    %25 = vector.broadcast %cst_14 : f32 to vector<8x128xf32>
    %26 = tpu.concatenate %24, %25 in 1 : vector<8x128xf32>, vector<8x128xf32> -> vector<8x256xf32>
    %c0_15 = arith.constant 0 : index
    %c0_16 = arith.constant 0 : index
    %27 = vector.load %arg9[%c0_15, %c0_16] : memref<256x256xf32, #tpu.memory_space<vmem>>, vector<256x256xf32>
    %cst_17 = arith.constant dense<0.000000e+00> : vector<8x256xf32>
    %28 = tpu.matmul %26, %27, %cst_17 {dimension_numbers = #tpu.dot_dimension_numbers<[1], [0], [0], [1], [0, 0, 1, 1], [], []>} : vector<8x256xf32>, vector<256x256xf32>, vector<8x256xf32> -> vector<8x256xf32>
    %29 = vector.extract_strided_slice %28 {offsets = [0, 0], sizes = [8, 128], strides = [1, 1]} : vector<8x256xf32> to vector<8x128xf32>
    %30 = arith.addf %13, %29 : vector<8x128xf32>
    %31 = math.tanh %30 : vector<8x128xf32>
    %c0_18 = arith.constant 0 : index
    %c0_19 = arith.constant 0 : index
    %32 = vector.load %arg10[%c0_18, %c0_19] : memref<128x128xf32, #tpu.memory_space<vmem>>, vector<128x128xf32>
    %cst_20 = arith.constant dense<0.000000e+00> : vector<8x128xf32>
    %33 = tpu.matmul %31, %32, %cst_20 {dimension_numbers = #tpu.dot_dimension_numbers<[1], [0], [0], [1], [0, 0, 1, 1], [], []>} : vector<8x128xf32>, vector<128x128xf32>, vector<8x128xf32> -> vector<8x128xf32>
    %34 = vector.extract_strided_slice %28 {offsets = [0, 128], sizes = [8, 128], strides = [1, 1]} : vector<8x256xf32> to vector<8x128xf32>
    %35 = arith.addf %33, %34 : vector<8x128xf32>
    %36 = vector.broadcast %8 : vector<1x128xf32> to vector<8x128xf32>
    %37 = arith.addf %35, %36 : vector<8x128xf32>
    %38 = math.tanh %37 : vector<8x128xf32>
    %39 = vector.extract_strided_slice %19 {offsets = [0, 0, 0], sizes = [1, 8, 128], strides = [1, 1, 1]} : vector<7x8x128xf32> to vector<1x8x128xf32>
    %40 = vector.shape_cast %39 : vector<1x8x128xf32> to vector<8x128xf32>
    %41 = tpu.concatenate %31, %38 in 1 : vector<8x128xf32>, vector<8x128xf32> -> vector<8x256xf32>
    %c0_21 = arith.constant 0 : index
    %c0_22 = arith.constant 0 : index
    %42 = vector.load %arg9[%c0_21, %c0_22] : memref<256x256xf32, #tpu.memory_space<vmem>>, vector<256x256xf32>
    %cst_23 = arith.constant dense<0.000000e+00> : vector<8x256xf32>
    %43 = tpu.matmul %41, %42, %cst_23 {dimension_numbers = #tpu.dot_dimension_numbers<[1], [0], [0], [1], [0, 0, 1, 1], [], []>} : vector<8x256xf32>, vector<256x256xf32>, vector<8x256xf32> -> vector<8x256xf32>
    %44 = vector.extract_strided_slice %43 {offsets = [0, 0], sizes = [8, 128], strides = [1, 1]} : vector<8x256xf32> to vector<8x128xf32>
    %45 = arith.addf %40, %44 : vector<8x128xf32>
    %46 = math.tanh %45 : vector<8x128xf32>
    %c0_24 = arith.constant 0 : index
    %c0_25 = arith.constant 0 : index
    %47 = vector.load %arg10[%c0_24, %c0_25] : memref<128x128xf32, #tpu.memory_space<vmem>>, vector<128x128xf32>
    %cst_26 = arith.constant dense<0.000000e+00> : vector<8x128xf32>
    %48 = tpu.matmul %46, %47, %cst_26 {dimension_numbers = #tpu.dot_dimension_numbers<[1], [0], [0], [1], [0, 0, 1, 1], [], []>} : vector<8x128xf32>, vector<128x128xf32>, vector<8x128xf32> -> vector<8x128xf32>
    %49 = vector.extract_strided_slice %43 {offsets = [0, 128], sizes = [8, 128], strides = [1, 1]} : vector<8x256xf32> to vector<8x128xf32>
    %50 = arith.addf %48, %49 : vector<8x128xf32>
    %51 = vector.broadcast %8 : vector<1x128xf32> to vector<8x128xf32>
    %52 = arith.addf %50, %51 : vector<8x128xf32>
    %53 = math.tanh %52 : vector<8x128xf32>
    %54 = vector.extract_strided_slice %19 {offsets = [1, 0, 0], sizes = [1, 8, 128], strides = [1, 1, 1]} : vector<7x8x128xf32> to vector<1x8x128xf32>
    %55 = vector.shape_cast %54 : vector<1x8x128xf32> to vector<8x128xf32>
    %56 = tpu.concatenate %46, %53 in 1 : vector<8x128xf32>, vector<8x128xf32> -> vector<8x256xf32>
    %c0_27 = arith.constant 0 : index
    %c0_28 = arith.constant 0 : index
    %57 = vector.load %arg9[%c0_27, %c0_28] : memref<256x256xf32, #tpu.memory_space<vmem>>, vector<256x256xf32>
    %cst_29 = arith.constant dense<0.000000e+00> : vector<8x256xf32>
    %58 = tpu.matmul %56, %57, %cst_29 {dimension_numbers = #tpu.dot_dimension_numbers<[1], [0], [0], [1], [0, 0, 1, 1], [], []>} : vector<8x256xf32>, vector<256x256xf32>, vector<8x256xf32> -> vector<8x256xf32>
    %59 = vector.extract_strided_slice %58 {offsets = [0, 0], sizes = [8, 128], strides = [1, 1]} : vector<8x256xf32> to vector<8x128xf32>
    %60 = arith.addf %55, %59 : vector<8x128xf32>
    %61 = math.tanh %60 : vector<8x128xf32>
    %c0_30 = arith.constant 0 : index
    %c0_31 = arith.constant 0 : index
    %62 = vector.load %arg10[%c0_30, %c0_31] : memref<128x128xf32, #tpu.memory_space<vmem>>, vector<128x128xf32>
    %cst_32 = arith.constant dense<0.000000e+00> : vector<8x128xf32>
    %63 = tpu.matmul %61, %62, %cst_32 {dimension_numbers = #tpu.dot_dimension_numbers<[1], [0], [0], [1], [0, 0, 1, 1], [], []>} : vector<8x128xf32>, vector<128x128xf32>, vector<8x128xf32> -> vector<8x128xf32>
    %64 = vector.extract_strided_slice %58 {offsets = [0, 128], sizes = [8, 128], strides = [1, 1]} : vector<8x256xf32> to vector<8x128xf32>
    %65 = arith.addf %63, %64 : vector<8x128xf32>
    %66 = vector.broadcast %8 : vector<1x128xf32> to vector<8x128xf32>
    %67 = arith.addf %65, %66 : vector<8x128xf32>
    %68 = math.tanh %67 : vector<8x128xf32>
    %69 = vector.extract_strided_slice %19 {offsets = [2, 0, 0], sizes = [1, 8, 128], strides = [1, 1, 1]} : vector<7x8x128xf32> to vector<1x8x128xf32>
    %70 = vector.shape_cast %69 : vector<1x8x128xf32> to vector<8x128xf32>
    %71 = tpu.concatenate %61, %68 in 1 : vector<8x128xf32>, vector<8x128xf32> -> vector<8x256xf32>
    %c0_33 = arith.constant 0 : index
    %c0_34 = arith.constant 0 : index
    %72 = vector.load %arg9[%c0_33, %c0_34] : memref<256x256xf32, #tpu.memory_space<vmem>>, vector<256x256xf32>
    %cst_35 = arith.constant dense<0.000000e+00> : vector<8x256xf32>
    %73 = tpu.matmul %71, %72, %cst_35 {dimension_numbers = #tpu.dot_dimension_numbers<[1], [0], [0], [1], [0, 0, 1, 1], [], []>} : vector<8x256xf32>, vector<256x256xf32>, vector<8x256xf32> -> vector<8x256xf32>
    %74 = vector.extract_strided_slice %73 {offsets = [0, 0], sizes = [8, 128], strides = [1, 1]} : vector<8x256xf32> to vector<8x128xf32>
    %75 = arith.addf %70, %74 : vector<8x128xf32>
    %76 = math.tanh %75 : vector<8x128xf32>
    %c0_36 = arith.constant 0 : index
    %c0_37 = arith.constant 0 : index
    %77 = vector.load %arg10[%c0_36, %c0_37] : memref<128x128xf32, #tpu.memory_space<vmem>>, vector<128x128xf32>
    %cst_38 = arith.constant dense<0.000000e+00> : vector<8x128xf32>
    %78 = tpu.matmul %76, %77, %cst_38 {dimension_numbers = #tpu.dot_dimension_numbers<[1], [0], [0], [1], [0, 0, 1, 1], [], []>} : vector<8x128xf32>, vector<128x128xf32>, vector<8x128xf32> -> vector<8x128xf32>
    %79 = vector.extract_strided_slice %73 {offsets = [0, 128], sizes = [8, 128], strides = [1, 1]} : vector<8x256xf32> to vector<8x128xf32>
    %80 = arith.addf %78, %79 : vector<8x128xf32>
    %81 = vector.broadcast %8 : vector<1x128xf32> to vector<8x128xf32>
    %82 = arith.addf %80, %81 : vector<8x128xf32>
    %83 = math.tanh %82 : vector<8x128xf32>
    %84 = vector.extract_strided_slice %19 {offsets = [3, 0, 0], sizes = [1, 8, 128], strides = [1, 1, 1]} : vector<7x8x128xf32> to vector<1x8x128xf32>
    %85 = vector.shape_cast %84 : vector<1x8x128xf32> to vector<8x128xf32>
    %86 = tpu.concatenate %76, %83 in 1 : vector<8x128xf32>, vector<8x128xf32> -> vector<8x256xf32>
    %c0_39 = arith.constant 0 : index
    %c0_40 = arith.constant 0 : index
    %87 = vector.load %arg9[%c0_39, %c0_40] : memref<256x256xf32, #tpu.memory_space<vmem>>, vector<256x256xf32>
    %cst_41 = arith.constant dense<0.000000e+00> : vector<8x256xf32>
    %88 = tpu.matmul %86, %87, %cst_41 {dimension_numbers = #tpu.dot_dimension_numbers<[1], [0], [0], [1], [0, 0, 1, 1], [], []>} : vector<8x256xf32>, vector<256x256xf32>, vector<8x256xf32> -> vector<8x256xf32>
    %89 = vector.extract_strided_slice %88 {offsets = [0, 0], sizes = [8, 128], strides = [1, 1]} : vector<8x256xf32> to vector<8x128xf32>
    %90 = arith.addf %85, %89 : vector<8x128xf32>
    %91 = math.tanh %90 : vector<8x128xf32>
    %c0_42 = arith.constant 0 : index
    %c0_43 = arith.constant 0 : index
    %92 = vector.load %arg10[%c0_42, %c0_43] : memref<128x128xf32, #tpu.memory_space<vmem>>, vector<128x128xf32>
    %cst_44 = arith.constant dense<0.000000e+00> : vector<8x128xf32>
    %93 = tpu.matmul %91, %92, %cst_44 {dimension_numbers = #tpu.dot_dimension_numbers<[1], [0], [0], [1], [0, 0, 1, 1], [], []>} : vector<8x128xf32>, vector<128x128xf32>, vector<8x128xf32> -> vector<8x128xf32>
    %94 = vector.extract_strided_slice %88 {offsets = [0, 128], sizes = [8, 128], strides = [1, 1]} : vector<8x256xf32> to vector<8x128xf32>
    %95 = arith.addf %93, %94 : vector<8x128xf32>
    %96 = vector.broadcast %8 : vector<1x128xf32> to vector<8x128xf32>
    %97 = arith.addf %95, %96 : vector<8x128xf32>
    %98 = math.tanh %97 : vector<8x128xf32>
    %99 = vector.extract_strided_slice %19 {offsets = [4, 0, 0], sizes = [1, 8, 128], strides = [1, 1, 1]} : vector<7x8x128xf32> to vector<1x8x128xf32>
    %100 = vector.shape_cast %99 : vector<1x8x128xf32> to vector<8x128xf32>
    %101 = tpu.concatenate %91, %98 in 1 : vector<8x128xf32>, vector<8x128xf32> -> vector<8x256xf32>
    %c0_45 = arith.constant 0 : index
    %c0_46 = arith.constant 0 : index
    %102 = vector.load %arg9[%c0_45, %c0_46] : memref<256x256xf32, #tpu.memory_space<vmem>>, vector<256x256xf32>
    %cst_47 = arith.constant dense<0.000000e+00> : vector<8x256xf32>
    %103 = tpu.matmul %101, %102, %cst_47 {dimension_numbers = #tpu.dot_dimension_numbers<[1], [0], [0], [1], [0, 0, 1, 1], [], []>} : vector<8x256xf32>, vector<256x256xf32>, vector<8x256xf32> -> vector<8x256xf32>
    %104 = vector.extract_strided_slice %103 {offsets = [0, 0], sizes = [8, 128], strides = [1, 1]} : vector<8x256xf32> to vector<8x128xf32>
    %105 = arith.addf %100, %104 : vector<8x128xf32>
    %106 = math.tanh %105 : vector<8x128xf32>
    %c0_48 = arith.constant 0 : index
    %c0_49 = arith.constant 0 : index
    %107 = vector.load %arg10[%c0_48, %c0_49] : memref<128x128xf32, #tpu.memory_space<vmem>>, vector<128x128xf32>
    %cst_50 = arith.constant dense<0.000000e+00> : vector<8x128xf32>
    %108 = tpu.matmul %106, %107, %cst_50 {dimension_numbers = #tpu.dot_dimension_numbers<[1], [0], [0], [1], [0, 0, 1, 1], [], []>} : vector<8x128xf32>, vector<128x128xf32>, vector<8x128xf32> -> vector<8x128xf32>
    %109 = vector.extract_strided_slice %103 {offsets = [0, 128], sizes = [8, 128], strides = [1, 1]} : vector<8x256xf32> to vector<8x128xf32>
    %110 = arith.addf %108, %109 : vector<8x128xf32>
    %111 = vector.broadcast %8 : vector<1x128xf32> to vector<8x128xf32>
    %112 = arith.addf %110, %111 : vector<8x128xf32>
    %113 = math.tanh %112 : vector<8x128xf32>
    %114 = vector.extract_strided_slice %19 {offsets = [5, 0, 0], sizes = [1, 8, 128], strides = [1, 1, 1]} : vector<7x8x128xf32> to vector<1x8x128xf32>
    %115 = vector.shape_cast %114 : vector<1x8x128xf32> to vector<8x128xf32>
    %116 = tpu.concatenate %106, %113 in 1 : vector<8x128xf32>, vector<8x128xf32> -> vector<8x256xf32>
    %c0_51 = arith.constant 0 : index
    %c0_52 = arith.constant 0 : index
    %117 = vector.load %arg9[%c0_51, %c0_52] : memref<256x256xf32, #tpu.memory_space<vmem>>, vector<256x256xf32>
    %cst_53 = arith.constant dense<0.000000e+00> : vector<8x256xf32>
    %118 = tpu.matmul %116, %117, %cst_53 {dimension_numbers = #tpu.dot_dimension_numbers<[1], [0], [0], [1], [0, 0, 1, 1], [], []>} : vector<8x256xf32>, vector<256x256xf32>, vector<8x256xf32> -> vector<8x256xf32>
    %119 = vector.extract_strided_slice %118 {offsets = [0, 0], sizes = [8, 128], strides = [1, 1]} : vector<8x256xf32> to vector<8x128xf32>
    %120 = arith.addf %115, %119 : vector<8x128xf32>
    %121 = math.tanh %120 : vector<8x128xf32>
    %c0_54 = arith.constant 0 : index
    %c0_55 = arith.constant 0 : index
    %122 = vector.load %arg10[%c0_54, %c0_55] : memref<128x128xf32, #tpu.memory_space<vmem>>, vector<128x128xf32>
    %cst_56 = arith.constant dense<0.000000e+00> : vector<8x128xf32>
    %123 = tpu.matmul %121, %122, %cst_56 {dimension_numbers = #tpu.dot_dimension_numbers<[1], [0], [0], [1], [0, 0, 1, 1], [], []>} : vector<8x128xf32>, vector<128x128xf32>, vector<8x128xf32> -> vector<8x128xf32>
    %124 = vector.extract_strided_slice %118 {offsets = [0, 128], sizes = [8, 128], strides = [1, 1]} : vector<8x256xf32> to vector<8x128xf32>
    %125 = arith.addf %123, %124 : vector<8x128xf32>
    %126 = vector.broadcast %8 : vector<1x128xf32> to vector<8x128xf32>
    %127 = arith.addf %125, %126 : vector<8x128xf32>
    %128 = math.tanh %127 : vector<8x128xf32>
    %129 = vector.extract_strided_slice %19 {offsets = [6, 0, 0], sizes = [1, 8, 128], strides = [1, 1, 1]} : vector<7x8x128xf32> to vector<1x8x128xf32>
    %130 = vector.shape_cast %129 : vector<1x8x128xf32> to vector<8x128xf32>
    %131 = tpu.concatenate %121, %128 in 1 : vector<8x128xf32>, vector<8x128xf32> -> vector<8x256xf32>
    %c0_57 = arith.constant 0 : index
    %c0_58 = arith.constant 0 : index
    %132 = vector.load %arg9[%c0_57, %c0_58] : memref<256x256xf32, #tpu.memory_space<vmem>>, vector<256x256xf32>
    %cst_59 = arith.constant dense<0.000000e+00> : vector<8x256xf32>
    %133 = tpu.matmul %131, %132, %cst_59 {dimension_numbers = #tpu.dot_dimension_numbers<[1], [0], [0], [1], [0, 0, 1, 1], [], []>} : vector<8x256xf32>, vector<256x256xf32>, vector<8x256xf32> -> vector<8x256xf32>
    %134 = vector.extract_strided_slice %133 {offsets = [0, 0], sizes = [8, 128], strides = [1, 1]} : vector<8x256xf32> to vector<8x128xf32>
    %135 = arith.addf %130, %134 : vector<8x128xf32>
    %136 = math.tanh %135 : vector<8x128xf32>
    %c0_60 = arith.constant 0 : index
    %c0_61 = arith.constant 0 : index
    %137 = vector.load %arg10[%c0_60, %c0_61] : memref<128x128xf32, #tpu.memory_space<vmem>>, vector<128x128xf32>
    %cst_62 = arith.constant dense<0.000000e+00> : vector<8x128xf32>
    %138 = tpu.matmul %136, %137, %cst_62 {dimension_numbers = #tpu.dot_dimension_numbers<[1], [0], [0], [1], [0, 0, 1, 1], [], []>} : vector<8x128xf32>, vector<128x128xf32>, vector<8x128xf32> -> vector<8x128xf32>
    %139 = vector.extract_strided_slice %133 {offsets = [0, 128], sizes = [8, 128], strides = [1, 1]} : vector<8x256xf32> to vector<8x128xf32>
    %140 = arith.addf %138, %139 : vector<8x128xf32>
    %141 = vector.broadcast %8 : vector<1x128xf32> to vector<8x128xf32>
    %142 = arith.addf %140, %141 : vector<8x128xf32>
    %143 = math.tanh %142 : vector<8x128xf32>
    %c2_i32_63 = arith.constant 2 : i32
    %144 = tpu.memref_slice %arg12[%c2_i32_63] : memref<3x!tpu.dma_semaphore, #tpu.memory_space<semaphore_mem>> -> memref<1x!tpu.dma_semaphore, #tpu.memory_space<semaphore_mem>>
    %145 = tpu.memref_squeeze %144 : memref<1x!tpu.dma_semaphore, #tpu.memory_space<semaphore_mem>> -> memref<!tpu.dma_semaphore, #tpu.memory_space<semaphore_mem>>
    tpu.wait_dma2 semaphore(%145 : memref<!tpu.dma_semaphore, #tpu.memory_space<semaphore_mem>>) src(%arg7 : memref<128x128xf32, #tpu.memory_space<any>>) dst(%arg11 : memref<128x128xf32, #tpu.memory_space<vmem>>)
    %c0_64 = arith.constant 0 : index
    %c0_65 = arith.constant 0 : index
    %146 = vector.load %arg11[%c0_64, %c0_65] : memref<128x128xf32, #tpu.memory_space<vmem>>, vector<128x128xf32>
    %cst_66 = arith.constant dense<0.000000e+00> : vector<8x128xf32>
    %147 = tpu.matmul %143, %146, %cst_66 {dimension_numbers = #tpu.dot_dimension_numbers<[1], [0], [0], [1], [0, 0, 1, 1], [], []>} : vector<8x128xf32>, vector<128x128xf32>, vector<8x128xf32> -> vector<8x128xf32>
    %c0_67 = arith.constant 0 : index
    %c0_68 = arith.constant 0 : index
    %148 = vector.load %arg4[%c0_67, %c0_68] : memref<1x128xf32, #tpu.memory_space<vmem>>, vector<1x128xf32>
    %149 = vector.broadcast %148 : vector<1x128xf32> to vector<8x128xf32>
    %150 = arith.addf %147, %149 : vector<8x128xf32>
    %c0_69 = arith.constant 0 : index
    %c0_70 = arith.constant 0 : index
    %151 = vector.load %arg8[%c0_69, %c0_70] : memref<8x128xf32, #tpu.memory_space<vmem>>, vector<8x128xf32>
    tpu.vector_store %arg8[%c0_69, %c0_70], %150 {strides = array<i32>} : memref<8x128xf32, #tpu.memory_space<vmem>>, vector<8x128xf32>,
    return
  }
}

</mosaic_0001>

<bundles_post_ra>
// kernel: rnn_forward.1
= control target key start
LH: loop header
LB: loop body
LE: loop exit
PB: predicated region body
PF: predicated region fallthrough
CT: control target
= control target key end

     0   :  { %s1436_s14 = smov [#allocation2]   ;;  %s1437_s19 = smov [#allocation3]   ;;  %s2651_s1 = inlined_call_operand.vmem [shape: f32[256,128], index: 1, kind: input, shape index: {}]   ;;  %s2652_s2 = inlined_call_operand.vmem [shape: f32[1,128], index: 2, kind: input, shape index: {}]   ;;  %s2653_s0 = inlined_call_operand.vmem [shape: f32[8,8,256], index: 0, kind: input, shape index: {}]   ;;  %s2654_s5 = inlined_call_operand.hbm [shape: f32[256,256], index: 5, kind: input, shape index: {}]   ;;  %s2655_s6 = inlined_call_operand.hbm [shape: f32[128,128], index: 6, kind: input, shape index: {}]   ;;  %s2656_s4 = inlined_call_operand.vmem [shape: f32[1,128], index: 4, kind: input, shape index: {}]   ;;  %s2657_s8 = inlined_call_operand.vmem [shape: f32[8,128], index: 8, kind: output, shape index: {}]   ;;  %s2658_s7 = inlined_call_operand.hbm [shape: f32[128,128], index: 7, kind: input, shape index: {}]   ;;  %s2659_s3 = inlined_call_operand.vmem [shape: f32[1,128], index: 3, kind: input, shape index: {}]  }
   0x1   :  { %v79_v0 = vld [vmem:[%s2651_s1 + $0x78] sm:$0xff]  ;;  %v78_v1 = vld [vmem:[%s2651_s1 + $0x70] sm:$0xff]  ;;  %v77_v4 = vld [vmem:[%s2651_s1 + $0x68] sm:$0xff]  ;;  %s30_s13 = sshll.u32 %s2654_s5, 4  ;;  %s32_s15 = sshll.u32 %s1436_s14, 4  ;;  %s31_s13 = int_to_ptr.hbm [resolvable:$true] %s30_s13  ;;  %s33_s15 = int_to_ptr.vmem [resolvable:$true] %s32_s15 }
   0x2   :  { %v95_v2 = vld [vmem:[%s2651_s1 + $0xf8] sm:$0xff]  ;;  %158 = vmatpush.msra.mxu2 %v79_v0  ;;  %v94_v3 = vld [vmem:[%s2651_s1 + $0xf0] sm:$0xff]  ;;  %v93_v5 = vld [vmem:[%s2651_s1 + $0xe8] sm:$0xff]  ;;  %103 = vmatpush.msra.mxu0 %v79_v0  ;;  %35 = dma.hbm_to_vmem [thread:$0]  %s31_s13, 8192, %s33_s15, [#allocation5] }
   0x3   :  { %196 = vmatpush.msra.mxu3 %v95_v2  ;;  %123 = vmatpush.msra.mxu1 %v95_v2  ;;  %v76_v6 = vld [vmem:[%s2651_s1 + $0x60] sm:$0xff]  ;;  %v75_v8 = vld [vmem:[%s2651_s1 + $0x58] sm:$0xff]  ;;  %v74_v10 = vld [vmem:[%s2651_s1 + $0x50] sm:$0xff]  ;;  %s44_s18 = sshll.u32 %s2655_s6, 4  ;;  %s46_s20 = sshll.u32 %s1437_s19, 4  ;;  %s45_s18 = int_to_ptr.hbm [resolvable:$true] %s44_s18  ;;  %s47_s20 = int_to_ptr.vmem [resolvable:$true] %s46_s20 }
   0x4   :  { %159 = vmatpush.msra.mxu2 %v78_v1  ;;  %v92_v7 = vld [vmem:[%s2651_s1 + $0xe0] sm:$0xff]  ;;  %104 = vmatpush.msra.mxu0 %v78_v1  ;;  %v91_v9 = vld [vmem:[%s2651_s1 + $0xd8] sm:$0xff]  ;;  %v90_v11 = vld [vmem:[%s2651_s1 + $0xd0] sm:$0xff]  ;;  %s58_s22 = sshll.u32 %s2658_s7, 4  ;;  %s1438_s5 = smov [#allocation4]   ;;  %s59_s22 = int_to_ptr.hbm [resolvable:$true] %s58_s22 }
   0x5   :  { %197 = vmatpush.msra.mxu3 %v94_v3  ;;  %124 = vmatpush.msra.mxu1 %v94_v3  ;;  %v73_v12 = vld [vmem:[%s2651_s1 + $0x48] sm:$0xff]  ;;  %v72_v14 = vld [vmem:[%s2651_s1 + $0x40] sm:$0xff]  ;;  %v71_v16 = vld [vmem:[%s2651_s1 + $0x38] sm:$0xff]  ;;  %49 = dma.hbm_to_vmem [thread:$0]  %s45_s18, 2048, %s47_s20, [#allocation5 + $0x1] }
   0x6   :  { %160 = vmatpush.msra.mxu2 %v77_v4  ;;  %105 = vmatpush.msra.mxu0 %v77_v4  ;;  %v89_v13 = vld [vmem:[%s2651_s1 + $0xc8] sm:$0xff]  ;;  %v88_v15 = vld [vmem:[%s2651_s1 + $0xc0] sm:$0xff]  ;;  %v87_v17 = vld [vmem:[%s2651_s1 + $0xb8] sm:$0xff]  ;;  %s60_s23 = sshll.u32 %s1438_s5, 4  ;;  %s61_s23 = int_to_ptr.vmem [resolvable:$true] %s60_s23 }
   0x7   :  { %198 = vmatpush.msra.mxu3 %v93_v5  ;;  %125 = vmatpush.msra.mxu1 %v93_v5  ;;  %v70_v18 = vld [vmem:[%s2651_s1 + $0x30] sm:$0xff]  ;;  %v69_v20 = vld [vmem:[%s2651_s1 + $0x28] sm:$0xff]  ;;  %v68_v22 = vld [vmem:[%s2651_s1 + $0x20] sm:$0xff]  ;;  %63 = dma.hbm_to_vmem [thread:$0]  %s59_s22, 2048, %s61_s23, [#allocation5 + $0x2] }
   0x8   :  { %161 = vmatpush.msra.mxu2 %v76_v6  ;;  %106 = vmatpush.msra.mxu0 %v76_v6  ;;  %v86_v19 = vld [vmem:[%s2651_s1 + $0xb0] sm:$0xff]  ;;  %v85_v21 = vld [vmem:[%s2651_s1 + $0xa8] sm:$0xff]  ;;  %v84_v23 = vld [vmem:[%s2651_s1 + $0xa0] sm:$0xff] }
   0x9   :  { %199 = vmatpush.msra.mxu3 %v92_v7  ;;  %126 = vmatpush.msra.mxu1 %v92_v7  ;;  %v67_v24 = vld [vmem:[%s2651_s1 + $0x18] sm:$0xff]  ;;  %v66_v26 = vld [vmem:[%s2651_s1 + $0x10] sm:$0xff]  ;;  %v65_v28 = vld [vmem:[%s2651_s1 + $0x8] sm:$0xff] }
   0xa   :  { %162 = vmatpush.msra.mxu2 %v75_v8  ;;  %107 = vmatpush.msra.mxu0 %v75_v8  ;;  %v83_v25 = vld [vmem:[%s2651_s1 + $0x98] sm:$0xff]  ;;  %v82_v27 = vld [vmem:[%s2651_s1 + $0x90] sm:$0xff]  ;;  %v81_v29 = vld [vmem:[%s2651_s1 + $0x88] sm:$0xff] }
   0xb   :  { %200 = vmatpush.msra.mxu3 %v91_v9  ;;  %127 = vmatpush.msra.mxu1 %v91_v9  ;;  %v64_v30 = vld [vmem:[%s2651_s1] sm:$0xff]  ;;  %v1223_v32 = vld [vmem:[%s2653_s0 + $0x10] sm:$0xff]  ;;  %v1224_v33 = vld [vmem:[%s2653_s0 + $0x18] sm:$0xff] }
   0xc   :  { %163 = vmatpush.msra.mxu2 %v74_v10  ;;  %108 = vmatpush.msra.mxu0 %v74_v10  ;;  %v80_v31 = vld [vmem:[%s2651_s1 + $0x80] sm:$0xff]  ;;  %v1226_v35 = vld [vmem:[%s2653_s0 + $0x28] sm:$0xff]  ;;  %v1227_v36 = vld [vmem:[%s2653_s0 + $0x30] sm:$0xff] }
   0xd   :  { %201 = vmatpush.msra.mxu3 %v90_v11  ;;  %128 = vmatpush.msra.mxu1 %v90_v11  ;;  %v1225_v34 = vld [vmem:[%s2653_s0 + $0x20] sm:$0xff]  ;;  %v1228_v37 = vld [vmem:[%s2653_s0 + $0x38] sm:$0xff]  ;;  %v99_v39 = vld [vmem:[%s2653_s0 + $0x8] sm:$0xff] }
   0xe   :  { %164 = vmatpush.msra.mxu2 %v73_v12  ;;  %109 = vmatpush.msra.mxu0 %v73_v12  ;;  %v98_v38 = vld [vmem:[%s2653_s0] sm:$0xff]  ;;  %v1230_v41 = vld [vmem:[%s2653_s0 + $0x48] sm:$0xff]  ;;  %v1231_v42 = vld [vmem:[%s2653_s0 + $0x50] sm:$0xff] }
   0xf   :  { %202 = vmatpush.msra.mxu3 %v89_v13  ;;  %129 = vmatpush.msra.mxu1 %v89_v13  ;;  %v1229_v40 = vld [vmem:[%s2653_s0 + $0x40] sm:$0xff]  ;;  %v1232_v43 = vld [vmem:[%s2653_s0 + $0x58] sm:$0xff]  ;;  %v1234_v45 = vld [vmem:[%s2653_s0 + $0x68] sm:$0xff] }
  0x10   :  { %165 = vmatpush.msra.mxu2 %v72_v14  ;;  %110 = vmatpush.msra.mxu0 %v72_v14  ;;  %v1233_v44 = vld [vmem:[%s2653_s0 + $0x60] sm:$0xff]  ;;  %v1235_v46 = vld [vmem:[%s2653_s0 + $0x70] sm:$0xff]  ;;  %v1236_v47 = vld [vmem:[%s2653_s0 + $0x78] sm:$0xff] }
  0x11   :  { %203 = vmatpush.msra.mxu3 %v88_v15  ;;  %130 = vmatpush.msra.mxu1 %v88_v15  ;;  %v1244_v48 = vld [vmem:[%s2652_s2] ss:$0 sm:$0xff] }
  0x12   :  { %166 = vmatpush.msra.mxu2 %v71_v16  ;;  %111 = vmatpush.msra.mxu0 %v71_v16  ;;  %v1648_v62 = vld [vmem:[%s2659_s3] sm:$0x1] }
  0x13   :  { %204 = vmatpush.msra.mxu3 %v87_v17  ;;  %131 = vmatpush.msra.mxu1 %v87_v17  ;;  %2753 = vst [vmem:[#allocation19_spill] sm:$0xff] %v1648_v62 }
  0x14   :  { %167 = vmatpush.msra.mxu2 %v70_v18  ;;  %112 = vmatpush.msra.mxu0 %v70_v18 }
  0x15   :  { %205 = vmatpush.msra.mxu3 %v86_v19  ;;  %132 = vmatpush.msra.mxu1 %v86_v19 }
  0x16   :  { %168 = vmatpush.msra.mxu2 %v69_v20  ;;  %113 = vmatpush.msra.mxu0 %v69_v20 }
  0x17   :  { %206 = vmatpush.msra.mxu3 %v85_v21  ;;  %133 = vmatpush.msra.mxu1 %v85_v21 }
  0x18   :  { %169 = vmatpush.msra.mxu2 %v68_v22  ;;  %114 = vmatpush.msra.mxu0 %v68_v22 }
  0x19   :  { %207 = vmatpush.msra.mxu3 %v84_v23  ;;  %134 = vmatpush.msra.mxu1 %v84_v23 }
  0x1a   :  { %170 = vmatpush.msra.mxu2 %v67_v24  ;;  %115 = vmatpush.msra.mxu0 %v67_v24 }
  0x1b   :  { %208 = vmatpush.msra.mxu3 %v83_v25  ;;  %135 = vmatpush.msra.mxu1 %v83_v25 }
  0x1c   :  { %171 = vmatpush.msra.mxu2 %v66_v26  ;;  %116 = vmatpush.msra.mxu0 %v66_v26 }
  0x1d   :  { %209 = vmatpush.msra.mxu3 %v82_v27  ;;  %136 = vmatpush.msra.mxu1 %v82_v27 }
  0x1e   :  { %172 = vmatpush.msra.mxu2 %v65_v28  ;;  %117 = vmatpush.msra.mxu0 %v65_v28 }
  0x1f   :  { %210 = vmatpush.msra.mxu3 %v81_v29  ;;  %137 = vmatpush.msra.mxu1 %v81_v29 }
  0x20   :  { %173 = vmatpush.msra.mxu2 %v64_v30  ;;  %118 = vmatpush.msra.mxu0 %v64_v30 }
  0x21   :  { %211 = vmatpush.msra.mxu3 %v80_v31  ;;  %174 = vmatmul.f32.vlgmr.msra.gmra.mxu2 %v1223_v32 }
  0x22   :  { %212 = vmatmul.f32.vlgmr.msra.gmra.mxu3 %v1224_v33  ;;  %138 = vmatpush.msra.mxu1 %v80_v31 }
  0x23   :  { %119 = vmatmul.f32.vlgmr.msra.gmra.mxu0 %v98_v38  ;;  %139 = vmatmul.f32.vlgmr.msra.gmra.mxu1 %v99_v39 }
  0x29   :  { %177 = vmatmul.f32.gmra.mxu2 %v1225_v34 }
  0x2a   :  { %215 = vmatmul.f32.gmra.mxu3 %v1226_v35 }
  0x31   :  { %180 = vmatmul.f32.gmra.mxu2 %v1227_v36 }
  0x32   :  { %218 = vmatmul.f32.gmra.mxu3 %v1228_v37 }
  0x39   :  { %183 = vmatmul.f32.gmra.mxu2 %v1229_v40 }
  0x3a   :  { %221 = vmatmul.f32.gmra.mxu3 %v1230_v41 }
  0x41   :  { %186 = vmatmul.f32.gmra.mxu2 %v1231_v42 }
  0x42   :  { %224 = vmatmul.f32.gmra.mxu3 %v1232_v43 }
  0x49   :  { %189 = vmatmul.f32.gmra.mxu2 %v1233_v44 }
  0x4a   :  { %227 = vmatmul.f32.gmra.mxu3 %v1234_v45 }
  0x51   :  { %192 = vmatmul.f32.gmra.mxu2 %v1235_v46 }
  0x52   :  { %230 = vmatmul.f32.gmra.mxu3 %v1236_v47 }
  0xa0   :  { %v120_v57 = vpop.f32.mrf.mxu0  ;;  %v140_v63 = vpop.f32.mrf.mxu1 }
  0xa1   :  { %v121_v58 = vadd.f32 %v1244_v48, %v120_v57 }
  0xa3   :  { %v1650_v0 = vadd.f32 %v140_v63, %v121_v58 }
  0xa4   :  { %v175_v49 = vpop.f32.mrf.mxu2 }
  0xa5   :  { %v213_v50 = vpop.f32.mrf.mxu3  ;;  %v176_v51 = vadd.f32 %v1244_v48, %v175_v49 }
  0xa7   :  { %v1641_v52 = vadd.f32 %v213_v50, %v176_v51 }
  0xa9   :  { %2751 = vst [vmem:[#allocation17_spill] sm:$0xff] %v1641_v52 }
  0xac   :  { %v178_v53 = vpop.f32.mrf.mxu2 }
  0xad   :  { %v216_v54 = vpop.f32.mrf.mxu3  ;;  %v179_v55 = vadd.f32 %v1244_v48, %v178_v53 }
  0xaf   :  { %v1643_v56 = vadd.f32 %v216_v54, %v179_v55 }
  0xb1   :  { %2752 = vst [vmem:[#allocation18_spill] sm:$0xff] %v1643_v56 }
  0xb4   :  { %v181_v59 = vpop.f32.mrf.mxu2 }
  0xb5   :  { %v219_v60 = vpop.f32.mrf.mxu3  ;;  %v182_v61 = vadd.f32 %v1244_v48, %v181_v59 }
  0xb7   :  { %v1652_v1 = vadd.f32 %v219_v60, %v182_v61 }
  0xb9   :  { %2754 = vst [vmem:[#allocation20_spill] sm:$0xff] %v1652_v1 }
  0xbc   :  { %v184_v2 = vpop.f32.mrf.mxu2 }
  0xbd   :  { %v222_v3 = vpop.f32.mrf.mxu3  ;;  %v185_v4 = vadd.f32 %v1244_v48, %v184_v2 }
  0xbf   :  { %v1654_v5 = vadd.f32 %v222_v3, %v185_v4 }
  0xc1   :  { %2755 = vst [vmem:[#allocation21_spill] sm:$0xff] %v1654_v5 }
  0xc4   :  { %v187_v6 = vpop.f32.mrf.mxu2 }
  0xc5   :  { %v225_v7 = vpop.f32.mrf.mxu3  ;;  %v188_v8 = vadd.f32 %v1244_v48, %v187_v6 }
  0xc7   :  { %v1656_v9 = vadd.f32 %v225_v7, %v188_v8 }
  0xc9   :  { %2756 = vst [vmem:[#allocation22_spill] sm:$0xff] %v1656_v9 }
  0xcc   :  { %v190_v10 = vpop.f32.mrf.mxu2 }
  0xcd   :  { %v228_v11 = vpop.f32.mrf.mxu3  ;;  %v191_v12 = vadd.f32 %v1244_v48, %v190_v10 }
  0xcf   :  { %v1658_v13 = vadd.f32 %v228_v11, %v191_v12 }
  0xd1   :  { %2757 = vst [vmem:[#allocation23_spill] sm:$0xff] %v1658_v13 }
  0xd4   :  { %v193_v14 = vpop.f32.mrf.mxu2 }
  0xd5   :  { %v231_v15 = vpop.f32.mrf.mxu3  ;;  %v194_v16 = vadd.f32 %v1244_v48, %v193_v14 }
  0xd7   :  { %v1660_v17 = vadd.f32 %v231_v15, %v194_v16 }
  0xd9   :  { %2758 = vst [vmem:[#allocation24_spill] sm:$0xff] %v1660_v17 }
  0xda   :  { %1430 = dma.done.wait [#allocation5], 8192 }
  0xdb   :  { %1431 = vsyncadd [#allocation5], 4294959104 }
  0xdc   :  { %1432 = dma.done.wait [#allocation5 + $0x1], 2048 }
  0xdd   :  { %1433 = vsyncadd [#allocation5 + $0x1], 4294965248  ;;  %v1662_v18 = vld [vmem:[#allocation2 + $0xf0] sm:$0xff]  ;;  %v1666_v20 = vld [vmem:[#allocation2 + $0xe0] sm:$0xff]  ;;  %v2660_v15 = vmov 0.0  }
  0xde   :  { %2759 = vst [vmem:[#allocation25_spill] sm:$0xff] %v1662_v18  ;;  %v1664_v19 = vld [vmem:[#allocation2 + $0x1f0] sm:$0xff]  ;;  %305 = vmatpush.msrb.mxu0 %v1662_v18  ;;  %v1670_v21 = vld [vmem:[#allocation2 + $0x1e0] sm:$0xff]  ;;  %v1700_v32 = vld [vmem:[#allocation2 + $0x1f8] sm:$0xff] }
  0xdf   :  { %2760 = vst [vmem:[#allocation26_spill] sm:$0xff] %v1666_v20  ;;  %325 = vmatpush.msrb.mxu1 %v1664_v19  ;;  %v1672_v22 = vld [vmem:[#allocation2 + $0xd0] sm:$0xff]  ;;  %v1678_v24 = vld [vmem:[#allocation2 + $0xc0] sm:$0xff]  ;;  %v1704_v33 = vld [vmem:[#allocation2 + $0x1e8] sm:$0xff]  ;;  %365 = vmatpush.msrb.mxu3 %v1700_v32 }
  0xe0   :  { %2761 = vst [vmem:[#allocation27_spill] sm:$0xff] %v1672_v22  ;;  %v1674_v23 = vld [vmem:[#allocation2 + $0x1d0] sm:$0xff]  ;;  %306 = vmatpush.msrb.mxu0 %v1666_v20  ;;  %v1680_v25 = vld [vmem:[#allocation2 + $0x1c0] sm:$0xff]  ;;  %v1713_v36 = vld [vmem:[#allocation2 + $0x1d8] sm:$0xff] }
  0xe1   :  { %326 = vmatpush.msrb.mxu1 %v1670_v21  ;;  %2762 = vst [vmem:[#allocation28_spill] sm:$0xff] %v1678_v24  ;;  %v1684_v26 = vld [vmem:[#allocation2 + $0xb0] sm:$0xff]  ;;  %v1690_v28 = vld [vmem:[#allocation2 + $0xa0] sm:$0xff]  ;;  %366 = vmatpush.msrb.mxu3 %v1704_v33  ;;  %v1720_v39 = vld [vmem:[#allocation2 + $0xf8] sm:$0xff] }
  0xe2   :  { %307 = vmatpush.msrb.mxu0 %v1672_v22  ;;  %2763 = vst [vmem:[#allocation29_spill] sm:$0xff] %v1684_v26  ;;  %v1686_v27 = vld [vmem:[#allocation2 + $0x1b0] sm:$0xff]  ;;  %v1692_v29 = vld [vmem:[#allocation2 + $0x1a0] sm:$0xff]  ;;  %v1724_v40 = vld [vmem:[#allocation2 + $0x1c8] sm:$0xff]  ;;  %345 = vmatpush.msrb.mxu2 %v1720_v39 }
  0xe3   :  { %327 = vmatpush.msrb.mxu1 %v1674_v23  ;;  %2764 = vst [vmem:[#allocation30_spill] sm:$0xff] %v1690_v28  ;;  %v1696_v30 = vld [vmem:[#allocation2 + $0x90] sm:$0xff]  ;;  %v1706_v34 = vld [vmem:[#allocation2 + $0x80] sm:$0xff]  ;;  %v1726_v41 = vld [vmem:[#allocation2 + $0xe8] sm:$0xff]  ;;  %367 = vmatpush.msrb.mxu3 %v1713_v36 }
  0xe4   :  { %308 = vmatpush.msrb.mxu0 %v1678_v24  ;;  %v1698_v31 = vld [vmem:[#allocation2 + $0x190] sm:$0xff]  ;;  %v1708_v35 = vld [vmem:[#allocation2 + $0x180] sm:$0xff]  ;;  %v1736_v44 = vld [vmem:[#allocation2 + $0x1b8] sm:$0xff]  ;;  %346 = vmatpush.msrb.mxu2 %v1726_v41 }
  0xe5   :  { %328 = vmatpush.msrb.mxu1 %v1680_v25  ;;  %2765 = vst [vmem:[#allocation31_spill] sm:$0xff] %v1698_v31  ;;  %v1715_v37 = vld [vmem:[#allocation2 + $0x70] sm:$0xff]  ;;  %v1728_v42 = vld [vmem:[#allocation2 + $0x60] sm:$0xff]  ;;  %v1738_v45 = vld [vmem:[#allocation2 + $0xd8] sm:$0xff]  ;;  %368 = vmatpush.msrb.mxu3 %v1724_v40 }
  0xe6   :  { %309 = vmatpush.msrb.mxu0 %v1684_v26  ;;  %2766 = vst [vmem:[#allocation32_spill] sm:$0xff] %v1708_v35  ;;  %v1717_v38 = vld [vmem:[#allocation2 + $0x170] sm:$0xff]  ;;  %v1730_v43 = vld [vmem:[#allocation2 + $0x160] sm:$0xff]  ;;  %v1748_v48 = vld [vmem:[#allocation2 + $0x1a8] sm:$0xff]  ;;  %347 = vmatpush.msrb.mxu2 %v1738_v45 }
  0xe7   :  { %329 = vmatpush.msrb.mxu1 %v1686_v27  ;;  %2767 = vst [vmem:[#allocation33_spill] sm:$0xff] %v1717_v38  ;;  %v1740_v46 = vld [vmem:[#allocation2 + $0x50] sm:$0xff]  ;;  %v1750_v49 = vld [vmem:[#allocation2 + $0xc8] sm:$0xff]  ;;  %v1752_v50 = vld [vmem:[#allocation2 + $0x40] sm:$0xff]  ;;  %369 = vmatpush.msrb.mxu3 %v1736_v44 }
  0xe8   :  { %310 = vmatpush.msrb.mxu0 %v1690_v28  ;;  %2768 = vst [vmem:[#allocation34_spill] sm:$0xff] %v1730_v43  ;;  %v1742_v47 = vld [vmem:[#allocation2 + $0x150] sm:$0xff]  ;;  %v1754_v51 = vld [vmem:[#allocation2 + $0x140] sm:$0xff]  ;;  %v1760_v53 = vld [vmem:[#allocation2 + $0x198] sm:$0xff]  ;;  %348 = vmatpush.msrb.mxu2 %v1750_v49 }
  0xe9   :  { %330 = vmatpush.msrb.mxu1 %v1692_v29  ;;  %2769 = vst [vmem:[#allocation35_spill] sm:$0xff] %v1740_v46  ;;  %v1762_v54 = vld [vmem:[#allocation2 + $0xb8] sm:$0xff]  ;;  %v1764_v55 = vld [vmem:[#allocation2 + $0x30] sm:$0xff]  ;;  %370 = vmatpush.msrb.mxu3 %v1748_v48  ;;  %v1772_v58 = vld [vmem:[#allocation2 + $0x188] sm:$0xff] }
  0xea   :  { %311 = vmatpush.msrb.mxu0 %v1696_v30  ;;  %2770 = vst [vmem:[#allocation36_spill] sm:$0xff] %v1742_v47  ;;  %v1766_v57 = vld [vmem:[#allocation2 + $0x130] sm:$0xff]  ;;  %v1774_v59 = vld [vmem:[#allocation2 + $0xa8] sm:$0xff]  ;;  %v1776_v60 = vld [vmem:[#allocation2 + $0x20] sm:$0xff]  ;;  %349 = vmatpush.msrb.mxu2 %v1762_v54 }
  0xeb   :  { %331 = vmatpush.msrb.mxu1 %v1698_v31  ;;  %2771 = vst [vmem:[#allocation37_spill] sm:$0xff] %v1752_v50  ;;  %v1778_v61 = vld [vmem:[#allocation2 + $0x120] sm:$0xff]  ;;  %371 = vmatpush.msrb.mxu3 %v1760_v53  ;;  %v1784_v63 = vld [vmem:[#allocation2 + $0x178] sm:$0xff]  ;;  %v1788_v3 = vld [vmem:[#allocation2 + $0x10] sm:$0xff] }
  0xec   :  { %312 = vmatpush.msrb.mxu0 %v1706_v34  ;;  %2772 = vst [vmem:[#allocation38_spill] sm:$0xff] %v1754_v51  ;;  %v1786_v2 = vld [vmem:[#allocation2 + $0x98] sm:$0xff]  ;;  %v1790_v4 = vld [vmem:[#allocation2 + $0x110] sm:$0xff]  ;;  %350 = vmatpush.msrb.mxu2 %v1774_v59  ;;  %v1796_v6 = vld [vmem:[#allocation2 + $0x168] sm:$0xff] }
  0xed   :  { %332 = vmatpush.msrb.mxu1 %v1708_v35  ;;  %2773 = vst [vmem:[#allocation39_spill] sm:$0xff] %v1764_v55  ;;  %372 = vmatpush.msrb.mxu3 %v1772_v58  ;;  %v1798_v7 = vld [vmem:[#allocation2 + $0x88] sm:$0xff]  ;;  %v1800_v8 = vld [vmem:[#allocation2] sm:$0xff]  ;;  %v1809_v11 = vld [vmem:[#allocation2 + $0x158] sm:$0xff] }
  0xee   :  { %313 = vmatpush.msrb.mxu0 %v1715_v37  ;;  %2774 = vst [vmem:[#allocation40_spill] sm:$0xff] %v1766_v57  ;;  %v1802_v10 = vld [vmem:[#allocation2 + $0x100] sm:$0xff]  ;;  %351 = vmatpush.msrb.mxu2 %v1786_v2  ;;  %v1811_v12 = vld [vmem:[#allocation3 + $0x78] sm:$0xff]  ;;  %v1820_v16 = vld [vmem:[#allocation2 + $0x148] sm:$0xff] }
  0xef   :  { %333 = vmatpush.msrb.mxu1 %v1717_v38  ;;  %2775 = vst [vmem:[#allocation41_spill] sm:$0xff] %v1776_v60  ;;  %373 = vmatpush.msrb.mxu3 %v1784_v63  ;;  %v1816_v14 = vld [vmem:[#allocation2 + $0x78] sm:$0xff]  ;;  %v1822_v17 = vld [vmem:[#allocation3 + $0x70] sm:$0xff]  ;;  %v1826_v13 = vld [vmem:[#allocation2 + $0x68] sm:$0xff] }
  0xf0   :  { %314 = vmatpush.msrb.mxu0 %v1728_v42  ;;  %2776 = vst [vmem:[#allocation42_spill] sm:$0xff] %v1778_v61  ;;  %352 = vmatpush.msrb.mxu2 %v1798_v7  ;;  %v1828_v9 = vld [vmem:[#allocation2 + $0x138] sm:$0xff]  ;;  %v1831_v5 = vld [vmem:[#allocation3 + $0x68] sm:$0xff]  ;;  %v1841_v56 = vld [vmem:[#allocation3 + $0x60] sm:$0xff] }
  0xf1   :  { %334 = vmatpush.msrb.mxu1 %v1730_v43  ;;  %2777 = vst [vmem:[#allocation43_spill] sm:$0xff] %v1790_v4  ;;  %374 = vmatpush.msrb.mxu3 %v1796_v6  ;;  %v1838_v1 = vld [vmem:[#allocation2 + $0x128] sm:$0xff]  ;;  %v1848_v62 = vld [vmem:[#allocation2 + $0x118] sm:$0xff] }
  0xf2   :  { %315 = vmatpush.msrb.mxu0 %v1740_v46  ;;  %2778 = vst [vmem:[#allocation44_spill] sm:$0xff] %v1802_v10  ;;  %353 = vmatpush.msrb.mxu2 %v1816_v14  ;;  %v1846_v52 = vld [vmem:[#allocation2 + $0x48] sm:$0xff] }
  0xf3   :  { %335 = vmatpush.msrb.mxu1 %v1742_v47  ;;  %2779 = vst [vmem:[#allocation45_spill] sm:$0xff] %v1809_v11  ;;  %375 = vmatpush.msrb.mxu3 %v1809_v11 }
  0xf4   :  { %316 = vmatpush.msrb.mxu0 %v1752_v50  ;;  %2780 = vst [vmem:[#allocation46_spill] sm:$0xff] %v1811_v12  ;;  %354 = vmatpush.msrb.mxu2 %v1826_v13 }
  0xf5   :  { %336 = vmatpush.msrb.mxu1 %v1754_v51  ;;  %2781 = vst [vmem:[#allocation47_spill] sm:$0xff] %v1820_v16  ;;  %376 = vmatpush.msrb.mxu3 %v1820_v16 }
  0xf6   :  { %317 = vmatpush.msrb.mxu0 %v1764_v55  ;;  %2782 = vst [vmem:[#allocation48_spill] sm:$0xff] %v1822_v17 }
  0xf7   :  { %337 = vmatpush.msrb.mxu1 %v1766_v57  ;;  %2783 = vst [vmem:[#allocation49_spill] sm:$0xff] %v1828_v9  ;;  %377 = vmatpush.msrb.mxu3 %v1828_v9  ;;  %v1861_v9 = vld [vmem:[#allocation3 + $0x50] sm:$0xff] }
  0xf8   :  { %318 = vmatpush.msrb.mxu0 %v1776_v60  ;;  %2784 = vst [vmem:[#allocation50_spill] sm:$0xff] %v1838_v1 }
  0xf9   :  { %338 = vmatpush.msrb.mxu1 %v1778_v61  ;;  %2785 = vst [vmem:[#allocation51_spill] sm:$0xff] %v1841_v56  ;;  %378 = vmatpush.msrb.mxu3 %v1838_v1  ;;  %v1870_v1 = vld [vmem:[#allocation2 + $0x28] sm:$0xff] }
  0xfa   :  { %319 = vmatpush.msrb.mxu0 %v1788_v3  ;;  %2786 = vst [vmem:[#allocation52_spill] sm:$0xff] %v1846_v52 }
  0xfb   :  { %339 = vmatpush.msrb.mxu1 %v1790_v4  ;;  %2787 = vst [vmem:[#allocation53_spill] sm:$0xff] %v1848_v62  ;;  %379 = vmatpush.msrb.mxu3 %v1848_v62 }
  0xfc   :  { %320 = vmatpush.msrb.mxu0 %v1800_v8  ;;  %2792 = vst [vmem:[#allocation58_spill] sm:$0xff] %v1870_v1 }
  0xfd   :  { %340 = vmatpush.msrb.mxu1 %v1802_v10  ;;  %321 = vmatmul.f32.vlgmr.msrb.gmra.mxu0 %v2660_v15  ;;  %v1858_v10 = vld [vmem:[#allocation2 + $0x108] sm:$0xff] }
  0xfe   :  { %341 = vmatmul.f32.vlgmr.msrb.gmra.mxu1 %v2660_v15  ;;  %403 = vmatpush.msra.mxu0 %v1811_v12  ;;  %v1836_v15 = vld [vmem:[#allocation2 + $0x58] sm:$0xff]  ;;  %2790 = vst [vmem:[#allocation56_spill] sm:$0xff] %v1858_v10 }
  0xff   :  { %428 = vmatpush.msra.mxu1 %v1662_v18  ;;  %v1851_v18 = vld [vmem:[#allocation3 + $0x58] sm:$0xff]  ;;  %355 = vmatpush.msrb.mxu2 %v1836_v15 }
 0x100   :  { %404 = vmatpush.msra.mxu0 %v1822_v17  ;;  %2788 = vst [vmem:[#allocation54_spill] sm:$0xff] %v1851_v18  ;;  %380 = vmatpush.msrb.mxu3 %v1858_v10  ;;  %v2795_v10 = vmov 0.0  }
 0x101   :  { %429 = vmatpush.msra.mxu1 %v1666_v20  ;;  %v1856_v20 = vld [vmem:[#allocation2 + $0x38] sm:$0xff]  ;;  %356 = vmatpush.msrb.mxu2 %v1846_v52 }
 0x102   :  { %405 = vmatpush.msra.mxu0 %v1831_v5  ;;  %2789 = vst [vmem:[#allocation55_spill] sm:$0xff] %v1856_v20  ;;  %468 = vmatpush.msra.mxu3 %v1720_v39 }
 0x103   :  { %430 = vmatpush.msra.mxu1 %v1672_v22  ;;  %v1867_v22 = vld [vmem:[#allocation3 + $0x48] sm:$0xff]  ;;  %357 = vmatpush.msrb.mxu2 %v1856_v20 }
 0x104   :  { %406 = vmatpush.msra.mxu0 %v1841_v56  ;;  %2791 = vst [vmem:[#allocation57_spill] sm:$0xff] %v1867_v22  ;;  %469 = vmatpush.msra.mxu3 %v1726_v41 }
 0x105   :  { %431 = vmatpush.msra.mxu1 %v1678_v24  ;;  %v1876_v24 = vld [vmem:[#allocation3 + $0x40] sm:$0xff]  ;;  %358 = vmatpush.msrb.mxu2 %v1870_v1 }
 0x106   :  { %407 = vmatpush.msra.mxu0 %v1851_v18  ;;  %2793 = vst [vmem:[#allocation59_spill] sm:$0xff] %v1876_v24  ;;  %381 = vmatmul.f32.vlgmr.msrb.gmra.mxu3 %v2795_v10 }
 0x107   :  { %432 = vmatpush.msra.mxu1 %v1684_v26  ;;  %v1882_v26 = vld [vmem:[#allocation3 + $0x38] sm:$0xff]  ;;  %470 = vmatpush.msra.mxu3 %v1738_v45 }
 0x108   :  { %408 = vmatpush.msra.mxu0 %v1861_v9  ;;  %2794 = vst [vmem:[#allocation60_spill] sm:$0xff] %v1882_v26 }
 0x109   :  { %433 = vmatpush.msra.mxu1 %v1690_v28  ;;  %v1888_v28 = vld [vmem:[#allocation3 + $0x30] sm:$0xff]  ;;  %471 = vmatpush.msra.mxu3 %v1750_v49 }
 0x10a   :  { %409 = vmatpush.msra.mxu0 %v1867_v22  ;;  %2796 = vst [vmem:[#allocation61_spill] sm:$0xff] %v1888_v28 }
 0x10b   :  { %434 = vmatpush.msra.mxu1 %v1696_v30  ;;  %472 = vmatpush.msra.mxu3 %v1762_v54 }
 0x10c   :  { %410 = vmatpush.msra.mxu0 %v1876_v24 }
 0x10d   :  { %435 = vmatpush.msra.mxu1 %v1706_v34  ;;  %473 = vmatpush.msra.mxu3 %v1774_v59 }
 0x10e   :  { %411 = vmatpush.msra.mxu0 %v1882_v26 }
 0x10f   :  { %436 = vmatpush.msra.mxu1 %v1715_v37  ;;  %474 = vmatpush.msra.mxu3 %v1786_v2 }
 0x110   :  { %412 = vmatpush.msra.mxu0 %v1888_v28 }
 0x111   :  { %437 = vmatpush.msra.mxu1 %v1728_v42  ;;  %475 = vmatpush.msra.mxu3 %v1798_v7 }
 0x113   :  { %438 = vmatpush.msra.mxu1 %v1740_v46  ;;  %476 = vmatpush.msra.mxu3 %v1816_v14 }
 0x115   :  { %439 = vmatpush.msra.mxu1 %v1752_v50  ;;  %477 = vmatpush.msra.mxu3 %v1826_v13 }
 0x117   :  { %440 = vmatpush.msra.mxu1 %v1764_v55  ;;  %478 = vmatpush.msra.mxu3 %v1836_v15 }
 0x119   :  { %441 = vmatpush.msra.mxu1 %v1776_v60  ;;  %479 = vmatpush.msra.mxu3 %v1846_v52 }
 0x11b   :  { %442 = vmatpush.msra.mxu1 %v1788_v3  ;;  %480 = vmatpush.msra.mxu3 %v1856_v20 }
 0x11d   :  { %443 = vmatpush.msra.mxu1 %v1800_v8  ;;  %481 = vmatpush.msra.mxu3 %v1870_v1 }
 0x11f   :  { %510 = vmatpush.msrb.mxu1 %v1811_v12  ;;  %v1923_v12 = vld [vmem:[#allocation3 + $0x28] sm:$0xff] }
 0x120   :  { %2798 = vst [vmem:[#allocation63_spill] sm:$0xff] %v1923_v12  ;;  %413 = vmatpush.msra.mxu0 %v1923_v12 }
 0x121   :  { %511 = vmatpush.msrb.mxu1 %v1822_v17  ;;  %v1921_v17 = vld [vmem:[#allocation2 + $0x18] sm:$0xff] }
 0x122   :  { %2797 = vst [vmem:[#allocation62_spill] sm:$0xff] %v1921_v17  ;;  %359 = vmatpush.msrb.mxu2 %v1921_v17  ;;  %482 = vmatpush.msra.mxu3 %v1921_v17 }
 0x123   :  { %512 = vmatpush.msrb.mxu1 %v1831_v5 }
 0x125   :  { %513 = vmatpush.msrb.mxu1 %v1841_v56  ;;  %v1927_v56 = vld [vmem:[#allocation2 + $0x8] sm:$0xff] }
 0x126   :  { %2799 = vst [vmem:[#allocation64_spill] sm:$0xff] %v1927_v56  ;;  %360 = vmatpush.msrb.mxu2 %v1927_v56  ;;  %483 = vmatpush.msra.mxu3 %v1927_v56 }
 0x127   :  { %514 = vmatpush.msrb.mxu1 %v1851_v18  ;;  %v1929_v18 = vld [vmem:[#allocation3 + $0x20] sm:$0xff]  ;;  %361 = vmatmul.f32.vlgmr.msrb.gmra.mxu2 %v2795_v10 }
 0x128   :  { %2800 = vst [vmem:[#allocation65_spill] sm:$0xff] %v1929_v18  ;;  %414 = vmatpush.msra.mxu0 %v1929_v18  ;;  %448 = vmatpush.msra.mxu2 %v1664_v19  ;;  %v1949_v10 = vld [vmem:[#allocation3] sm:$0xff] }
 0x129   :  { %515 = vmatpush.msrb.mxu1 %v1861_v9  ;;  %552 = vmatpush.msrb.mxu3 %v1664_v19  ;;  %2804 = vst [vmem:[#allocation69_spill] sm:$0xff] %v1949_v10 }
 0x12a   :  { %449 = vmatpush.msra.mxu2 %v1670_v21 }
 0x12b   :  { %516 = vmatpush.msrb.mxu1 %v1867_v22  ;;  %553 = vmatpush.msrb.mxu3 %v1670_v21 }
 0x12c   :  { %450 = vmatpush.msra.mxu2 %v1674_v23 }
 0x12d   :  { %517 = vmatpush.msrb.mxu1 %v1876_v24  ;;  %v1943_v24 = vld [vmem:[#allocation3 + $0x8] sm:$0xff]  ;;  %554 = vmatpush.msrb.mxu3 %v1674_v23 }
 0x12e   :  { %2803 = vst [vmem:[#allocation68_spill] sm:$0xff] %v1943_v24  ;;  %451 = vmatpush.msra.mxu2 %v1680_v25 }
 0x12f   :  { %518 = vmatpush.msrb.mxu1 %v1882_v26  ;;  %v1940_v26 = vld [vmem:[#allocation3 + $0x10] sm:$0xff]  ;;  %555 = vmatpush.msrb.mxu3 %v1680_v25 }
 0x130   :  { %2802 = vst [vmem:[#allocation67_spill] sm:$0xff] %v1940_v26  ;;  %452 = vmatpush.msra.mxu2 %v1686_v27 }
 0x131   :  { %519 = vmatpush.msrb.mxu1 %v1888_v28  ;;  %v1936_v28 = vld [vmem:[#allocation3 + $0x18] sm:$0xff]  ;;  %556 = vmatpush.msrb.mxu3 %v1686_v27 }
 0x132   :  { %2801 = vst [vmem:[#allocation66_spill] sm:$0xff] %v1936_v28  ;;  %415 = vmatpush.msra.mxu0 %v1936_v28  ;;  %453 = vmatpush.msra.mxu2 %v1692_v29 }
 0x133   :  { %520 = vmatpush.msrb.mxu1 %v1923_v12  ;;  %557 = vmatpush.msrb.mxu3 %v1692_v29 }
 0x134   :  { %416 = vmatpush.msra.mxu0 %v1940_v26  ;;  %454 = vmatpush.msra.mxu2 %v1698_v31 }
 0x135   :  { %521 = vmatpush.msrb.mxu1 %v1929_v18  ;;  %558 = vmatpush.msrb.mxu3 %v1698_v31  ;;  %v2806_v18 = vld [vmem:[#allocation49_spill] sm:$0xff] }
 0x136   :  { %417 = vmatpush.msra.mxu0 %v1943_v24  ;;  %455 = vmatpush.msra.mxu2 %v1708_v35 }
 0x137   :  { %522 = vmatpush.msrb.mxu1 %v1936_v28  ;;  %559 = vmatpush.msrb.mxu3 %v1708_v35 }
 0x138   :  { %418 = vmatpush.msra.mxu0 %v1949_v10  ;;  %456 = vmatpush.msra.mxu2 %v1717_v38 }
 0x139   :  { %523 = vmatpush.msrb.mxu1 %v1940_v26  ;;  %560 = vmatpush.msrb.mxu3 %v1717_v38 }
 0x13a   :  { %488 = vmatpush.msrb.mxu0 %v1700_v32  ;;  %457 = vmatpush.msra.mxu2 %v1730_v43 }
 0x13b   :  { %524 = vmatpush.msrb.mxu1 %v1943_v24  ;;  %561 = vmatpush.msrb.mxu3 %v1730_v43 }
 0x13c   :  { %489 = vmatpush.msrb.mxu0 %v1704_v33  ;;  %458 = vmatpush.msra.mxu2 %v1742_v47 }
 0x13d   :  { %525 = vmatpush.msrb.mxu1 %v1949_v10  ;;  %562 = vmatpush.msrb.mxu3 %v1742_v47 }
 0x13e   :  { %490 = vmatpush.msrb.mxu0 %v1713_v36  ;;  %459 = vmatpush.msra.mxu2 %v1754_v51 }
 0x13f   :  { %563 = vmatpush.msrb.mxu3 %v1754_v51  ;;  %v2805_v51 = vld [vmem:[#allocation44_spill] sm:$0xff] }
 0x140   :  { %491 = vmatpush.msrb.mxu0 %v1724_v40  ;;  %460 = vmatpush.msra.mxu2 %v1766_v57 }
 0x141   :  { %564 = vmatpush.msrb.mxu3 %v1766_v57  ;;  %v2807_v57 = vld [vmem:[#allocation25_spill] sm:$0xff] }
 0x142   :  { %492 = vmatpush.msrb.mxu0 %v1736_v44  ;;  %461 = vmatpush.msra.mxu2 %v1778_v61 }
 0x143   :  { %565 = vmatpush.msrb.mxu3 %v1778_v61  ;;  %v2810_v61 = vld [vmem:[#allocation27_spill] sm:$0xff] }
 0x144   :  { %493 = vmatpush.msrb.mxu0 %v1748_v48  ;;  %462 = vmatpush.msra.mxu2 %v1790_v4 }
 0x145   :  { %566 = vmatpush.msrb.mxu3 %v1790_v4 }
 0x146   :  { %494 = vmatpush.msrb.mxu0 %v1760_v53  ;;  %463 = vmatpush.msra.mxu2 %v2805_v51 }
 0x147   :  { %567 = vmatpush.msrb.mxu3 %v2805_v51  ;;  %v2814_v51 = vld [vmem:[#allocation30_spill] sm:$0xff] }
 0x148   :  { %495 = vmatpush.msrb.mxu0 %v1772_v58  ;;  %532 = vmatpush.msrb.mxu2 %v2807_v57 }
 0x14a   :  { %496 = vmatpush.msrb.mxu0 %v1784_v63 }
 0x14c   :  { %497 = vmatpush.msrb.mxu0 %v1796_v6 }
 0x14e   :  { %498 = vmatpush.msrb.mxu0 %v1809_v11 }
 0x150   :  { %499 = vmatpush.msrb.mxu0 %v1820_v16 }
 0x152   :  { %500 = vmatpush.msrb.mxu0 %v2806_v18 }
 0x17a   :  { %v322_v10 = vpop.f32.mrf.mxu0 }
 0x17b   :  { %v342_v24 = vpop.f32.mrf.mxu1 }
 0x17c   :  { %v343_v26 = vadd.f32 %v342_v24, %v322_v10  ;;  %v2808_v24 = vld [vmem:[#allocation50_spill] sm:$0xff] }
 0x17d   :  { %501 = vmatpush.msrb.mxu0 %v2808_v24  ;;  %v2809_v10 = vld [vmem:[#allocation26_spill] sm:$0xff] }
 0x17e   :  { %v385_v28 = vadd.f32 %v343_v26, %v1650_v0  ;;  %533 = vmatpush.msrb.mxu2 %v2809_v10  ;;  %v2811_v0 = vld [vmem:[#allocation56_spill] sm:$0xff] }
 0x17f   :  { %502 = vmatpush.msrb.mxu0 %v1848_v62  ;;  %v2812_v26 = vld [vmem:[#allocation28_spill] sm:$0xff] }
 0x180   :  { %1245 = vtanh.f32 %v385_v28  ;;  %534 = vmatpush.msrb.mxu2 %v2810_v61  ;;  %v2813_v28 = vld [vmem:[#allocation29_spill] sm:$0xff] }
 0x181   :  { %503 = vmatpush.msrb.mxu0 %v2811_v0 }
 0x182   :  { %535 = vmatpush.msrb.mxu2 %v2812_v26 }
 0x184   :  { %536 = vmatpush.msrb.mxu2 %v2813_v28 }
 0x186   :  { %v1246_v4 = vpop.eup %1245  ;;  %537 = vmatpush.msrb.mxu2 %v2814_v51 }
 0x187   :  { %419 = vmatmul.f32.vlgmr.msra.gmra.mxu0 %v1246_v4  ;;  %444 = vmatmul.f32.vlgmr.msra.gmra.mxu1 %v1246_v4 }
 0x188   :  { %484 = vmatmul.f32.vlgmr.msra.gmra.mxu3 %v1246_v4  ;;  %572 = vmatpush.msra.mxu0 %v1720_v39 }
 0x189   :  { %592 = vmatpush.msra.mxu1 %v1700_v32  ;;  %636 = vmatpush.msra.mxu3 %v2807_v57 }
 0x18a   :  { %573 = vmatpush.msra.mxu0 %v1726_v41  ;;  %538 = vmatpush.msrb.mxu2 %v1696_v30 }
 0x18b   :  { %593 = vmatpush.msra.mxu1 %v1704_v33  ;;  %637 = vmatpush.msra.mxu3 %v2809_v10 }
 0x18c   :  { %574 = vmatpush.msra.mxu0 %v1738_v45  ;;  %539 = vmatpush.msrb.mxu2 %v1706_v34 }
 0x18d   :  { %594 = vmatpush.msra.mxu1 %v1713_v36  ;;  %638 = vmatpush.msra.mxu3 %v2810_v61 }
 0x18e   :  { %575 = vmatpush.msra.mxu0 %v1750_v49  ;;  %540 = vmatpush.msrb.mxu2 %v1715_v37 }
 0x18f   :  { %595 = vmatpush.msra.mxu1 %v1724_v40  ;;  %639 = vmatpush.msra.mxu3 %v2812_v26 }
 0x190   :  { %576 = vmatpush.msra.mxu0 %v1762_v54  ;;  %541 = vmatpush.msrb.mxu2 %v1728_v42 }
 0x191   :  { %596 = vmatpush.msra.mxu1 %v1736_v44  ;;  %640 = vmatpush.msra.mxu3 %v2813_v28 }
 0x192   :  { %577 = vmatpush.msra.mxu0 %v1774_v59  ;;  %542 = vmatpush.msrb.mxu2 %v1740_v46 }
 0x193   :  { %597 = vmatpush.msra.mxu1 %v1748_v48  ;;  %641 = vmatpush.msra.mxu3 %v2814_v51 }
 0x194   :  { %578 = vmatpush.msra.mxu0 %v1786_v2  ;;  %543 = vmatpush.msrb.mxu2 %v1752_v50 }
 0x195   :  { %598 = vmatpush.msra.mxu1 %v1760_v53  ;;  %642 = vmatpush.msra.mxu3 %v1696_v30 }
 0x196   :  { %579 = vmatpush.msra.mxu0 %v1798_v7  ;;  %544 = vmatpush.msrb.mxu2 %v1764_v55 }
 0x197   :  { %599 = vmatpush.msra.mxu1 %v1772_v58  ;;  %643 = vmatpush.msra.mxu3 %v1706_v34 }
 0x198   :  { %580 = vmatpush.msra.mxu0 %v1816_v14  ;;  %545 = vmatpush.msrb.mxu2 %v1776_v60 }
 0x199   :  { %600 = vmatpush.msra.mxu1 %v1784_v63  ;;  %644 = vmatpush.msra.mxu3 %v1715_v37 }
 0x19a   :  { %581 = vmatpush.msra.mxu0 %v1826_v13  ;;  %546 = vmatpush.msrb.mxu2 %v1788_v3 }
 0x19b   :  { %601 = vmatpush.msra.mxu1 %v1796_v6  ;;  %645 = vmatpush.msra.mxu3 %v1728_v42 }
 0x19c   :  { %582 = vmatpush.msra.mxu0 %v1836_v15  ;;  %547 = vmatpush.msrb.mxu2 %v1800_v8 }
 0x19d   :  { %602 = vmatpush.msra.mxu1 %v1809_v11  ;;  %646 = vmatpush.msra.mxu3 %v1740_v46 }
 0x19e   :  { %583 = vmatpush.msra.mxu0 %v1846_v52 }
 0x19f   :  { %603 = vmatpush.msra.mxu1 %v1820_v16  ;;  %647 = vmatpush.msra.mxu3 %v1752_v50 }
 0x1a0   :  { %584 = vmatpush.msra.mxu0 %v1856_v20 }
 0x1a1   :  { %604 = vmatpush.msra.mxu1 %v2806_v18  ;;  %648 = vmatpush.msra.mxu3 %v1764_v55  ;;  %v2815_v55 = vld [vmem:[#allocation19_spill] sm:$0xff] }
 0x1a2   :  { %585 = vmatpush.msra.mxu0 %v1870_v1  ;;  %v382_v1 = vpop.f32.mrf.mxu3  ;;  %v2068_v20 = vperm.slane %v2815_v55, 0  ;;  %v2822_v55 = vld [vmem:[#allocation61_spill] sm:$0xff] }
 0x1a3   :  { %605 = vmatpush.msra.mxu1 %v2808_v24  ;;  %649 = vmatpush.msra.mxu3 %v1776_v60 }
 0x1a4   :  { %586 = vmatpush.msra.mxu0 %v1921_v17 }
 0x1a5   :  { %606 = vmatpush.msra.mxu1 %v1848_v62  ;;  %650 = vmatpush.msra.mxu3 %v1788_v3 }
 0x1a6   :  { %587 = vmatpush.msra.mxu0 %v1927_v56  ;;  %v2816_v56 = vld [vmem:[#allocation46_spill] sm:$0xff] }
 0x1a7   :  { %607 = vmatpush.msra.mxu1 %v2811_v0  ;;  %651 = vmatpush.msra.mxu3 %v1800_v8  ;;  %v2817_v0 = vld [vmem:[#allocation48_spill] sm:$0xff] }
 0x1aa   :  { %v362_v4 = vpop.f32.mrf.mxu2 }
 0x1ab   :  { %v383_v18 = vadd.f32 %v382_v1, %v362_v4  ;;  %v2818_v1 = vld [vmem:[#allocation51_spill] sm:$0xff]  ;;  %v2825_v4 = vld [vmem:[#allocation66_spill] sm:$0xff] }
 0x204   :  { %v420_v24 = vpop.f32.mrf.mxu0 }
 0x205   :  { %v421_v17 = vadd.f32 %v420_v24, %v383_v18  ;;  %v2821_v18 = vld [vmem:[#allocation60_spill] sm:$0xff]  ;;  %v2824_v24 = vld [vmem:[#allocation38_spill] sm:$0xff] }
 0x207   :  { %v426_v60 = vadd.f32 %v2068_v20, %v421_v17  ;;  %v2819_v17 = vld [vmem:[#allocation54_spill] sm:$0xff] }
 0x209   :  { %1247 = vtanh.f32 %v426_v60  ;;  %v2823_v60 = vld [vmem:[#allocation65_spill] sm:$0xff] }
 0x20f   :  { %v1248_v62 = vpop.eup %1247 }
 0x210   :  { %464 = vmatmul.f32.vlgmr.msra.gmra.mxu2 %v1248_v62  ;;  %504 = vmatmul.f32.vlgmr.msrb.gmra.mxu0 %v1248_v62  ;;  %v2820_v62 = vld [vmem:[#allocation59_spill] sm:$0xff] }
 0x211   :  { %614 = vmatpush.msra.mxu2 %v2816_v56  ;;  %656 = vmatpush.msrb.mxu0 %v1664_v19 }
 0x213   :  { %615 = vmatpush.msra.mxu2 %v2817_v0  ;;  %657 = vmatpush.msrb.mxu0 %v1670_v21 }
 0x215   :  { %616 = vmatpush.msra.mxu2 %v1831_v5  ;;  %658 = vmatpush.msrb.mxu0 %v1674_v23 }
 0x217   :  { %617 = vmatpush.msra.mxu2 %v2818_v1  ;;  %659 = vmatpush.msrb.mxu0 %v1680_v25 }
 0x219   :  { %618 = vmatpush.msra.mxu2 %v2819_v17  ;;  %660 = vmatpush.msrb.mxu0 %v1686_v27 }
 0x21b   :  { %619 = vmatpush.msra.mxu2 %v1861_v9  ;;  %661 = vmatpush.msrb.mxu0 %v1692_v29 }
 0x21d   :  { %620 = vmatpush.msra.mxu2 %v1867_v22  ;;  %662 = vmatpush.msrb.mxu0 %v1698_v31 }
 0x21f   :  { %621 = vmatpush.msra.mxu2 %v2820_v62  ;;  %663 = vmatpush.msrb.mxu0 %v1708_v35  ;;  %v2826_v62 = vld [vmem:[#allocation40_spill] sm:$0xff]  ;;  %v2827_v35 = vld [vmem:[#allocation67_spill] sm:$0xff] }
 0x221   :  { %622 = vmatpush.msra.mxu2 %v2821_v18  ;;  %664 = vmatpush.msrb.mxu0 %v1717_v38  ;;  %v2828_v18 = vld [vmem:[#allocation42_spill] sm:$0xff]  ;;  %v2829_v38 = vld [vmem:[#allocation68_spill] sm:$0xff] }
 0x223   :  { %623 = vmatpush.msra.mxu2 %v2822_v55  ;;  %665 = vmatpush.msrb.mxu0 %v1730_v43  ;;  %v2830_v55 = vld [vmem:[#allocation43_spill] sm:$0xff]  ;;  %v2831_v43 = vld [vmem:[#allocation69_spill] sm:$0xff] }
 0x225   :  { %624 = vmatpush.msra.mxu2 %v1923_v12  ;;  %666 = vmatpush.msrb.mxu0 %v1742_v47  ;;  %v2832_v12 = vld [vmem:[#allocation44_spill] sm:$0xff]  ;;  %v445_v47 = vpop.f32.mrf.mxu1 }
 0x227   :  { %625 = vmatpush.msra.mxu2 %v2823_v60  ;;  %667 = vmatpush.msrb.mxu0 %v2824_v24  ;;  %v2833_v24 = vld [vmem:[#allocation17_spill] sm:$0xff] }
 0x229   :  { %626 = vmatpush.msra.mxu2 %v2825_v4  ;;  %668 = vmatpush.msrb.mxu0 %v2826_v62 }
 0x22b   :  { %627 = vmatpush.msra.mxu2 %v2827_v35  ;;  %669 = vmatpush.msrb.mxu0 %v2828_v18 }
 0x22d   :  { %628 = vmatpush.msra.mxu2 %v2829_v38  ;;  %670 = vmatpush.msrb.mxu0 %v2830_v55 }
 0x22f   :  { %629 = vmatpush.msra.mxu2 %v2831_v43  ;;  %671 = vmatpush.msrb.mxu0 %v2832_v12 }
 0x293   :  { %v465_v60 = vpop.f32.mrf.mxu2 }
 0x294   :  { %v466_v31 = vadd.f32 %v465_v60, %v445_v47  ;;  %v2836_v47 = vld [vmem:[#allocation39_spill] sm:$0xff]  ;;  %v2837_v60 = vld [vmem:[#allocation58_spill] sm:$0xff] }
 0x296   :  { %v508_v22 = vadd.f32 %v466_v31, %v2833_v24  ;;  %v2835_v31 = vld [vmem:[#allocation49_spill] sm:$0xff]  ;;  %v2838_v24 = vld [vmem:[#allocation50_spill] sm:$0xff] }
 0x298   :  { %1249 = vtanh.f32 %v508_v22  ;;  %v2834_v22 = vld [vmem:[#allocation55_spill] sm:$0xff] }
 0x29e   :  { %v1250_v4 = vpop.eup %1249 }
 0x29f   :  { %526 = vmatmul.f32.vlgmr.msrb.gmra.mxu1 %v1250_v4  ;;  %548 = vmatmul.f32.vlgmr.msrb.gmra.mxu2 %v1250_v4 }
 0x2a0   :  { %588 = vmatmul.f32.vlgmr.msra.gmra.mxu0 %v1250_v4  ;;  %676 = vmatpush.msrb.mxu1 %v1720_v39  ;;  %v2839_v4 = vld [vmem:[#allocation41_spill] sm:$0xff] }
 0x2a1   :  { %696 = vmatpush.msrb.mxu2 %v1700_v32  ;;  %740 = vmatpush.msra.mxu0 %v2807_v57 }
 0x2a2   :  { %677 = vmatpush.msrb.mxu1 %v1726_v41 }
 0x2a3   :  { %697 = vmatpush.msrb.mxu2 %v1704_v33  ;;  %741 = vmatpush.msra.mxu0 %v2809_v10 }
 0x2a4   :  { %678 = vmatpush.msrb.mxu1 %v1738_v45 }
 0x2a5   :  { %698 = vmatpush.msrb.mxu2 %v1713_v36  ;;  %742 = vmatpush.msra.mxu0 %v2810_v61 }
 0x2a6   :  { %679 = vmatpush.msrb.mxu1 %v1750_v49 }
 0x2a7   :  { %699 = vmatpush.msrb.mxu2 %v1724_v40  ;;  %743 = vmatpush.msra.mxu0 %v2812_v26 }
 0x2a8   :  { %680 = vmatpush.msrb.mxu1 %v1762_v54 }
 0x2a9   :  { %700 = vmatpush.msrb.mxu2 %v1736_v44  ;;  %744 = vmatpush.msra.mxu0 %v2813_v28 }
 0x2aa   :  { %681 = vmatpush.msrb.mxu1 %v1774_v59 }
 0x2ab   :  { %701 = vmatpush.msrb.mxu2 %v1748_v48  ;;  %745 = vmatpush.msra.mxu0 %v2814_v51 }
 0x2ac   :  { %682 = vmatpush.msrb.mxu1 %v1786_v2 }
 0x2ad   :  { %702 = vmatpush.msrb.mxu2 %v1760_v53  ;;  %746 = vmatpush.msra.mxu0 %v1696_v30 }
 0x2ae   :  { %683 = vmatpush.msrb.mxu1 %v1798_v7 }
 0x2af   :  { %703 = vmatpush.msrb.mxu2 %v1772_v58  ;;  %747 = vmatpush.msra.mxu0 %v1706_v34 }
 0x2b0   :  { %684 = vmatpush.msrb.mxu1 %v1816_v14 }
 0x2b1   :  { %704 = vmatpush.msrb.mxu2 %v1784_v63  ;;  %748 = vmatpush.msra.mxu0 %v1715_v37 }
 0x2b2   :  { %685 = vmatpush.msrb.mxu1 %v1826_v13 }
 0x2b3   :  { %705 = vmatpush.msrb.mxu2 %v1796_v6  ;;  %749 = vmatpush.msra.mxu0 %v1728_v42 }
 0x2b4   :  { %686 = vmatpush.msrb.mxu1 %v1836_v15 }
 0x2b5   :  { %706 = vmatpush.msrb.mxu2 %v1809_v11  ;;  %750 = vmatpush.msra.mxu0 %v1740_v46  ;;  %v2840_v11 = vld [vmem:[#allocation62_spill] sm:$0xff]  ;;  %v2841_v46 = vld [vmem:[#allocation53_spill] sm:$0xff] }
 0x2b6   :  { %687 = vmatpush.msrb.mxu1 %v1846_v52 }
 0x2b7   :  { %707 = vmatpush.msrb.mxu2 %v1820_v16  ;;  %751 = vmatpush.msra.mxu0 %v1752_v50  ;;  %v2842_v16 = vld [vmem:[#allocation64_spill] sm:$0xff] }
 0x2b8   :  { %688 = vmatpush.msrb.mxu1 %v2834_v22  ;;  %v2843_v50 = vld [vmem:[#allocation56_spill] sm:$0xff] }
 0x2b9   :  { %708 = vmatpush.msrb.mxu2 %v2835_v31  ;;  %752 = vmatpush.msra.mxu0 %v2836_v47  ;;  %v505_v31 = vpop.f32.mrf.mxu0  ;;  %v485_v47 = vpop.f32.mrf.mxu3 }
 0x2ba   :  { %689 = vmatpush.msrb.mxu1 %v2837_v60  ;;  %v506_v22 = vadd.f32 %v505_v31, %v485_v47  ;;  %v2849_v31 = vld [vmem:[#allocation33_spill] sm:$0xff]  ;;  %v2851_v47 = vld [vmem:[#allocation34_spill] sm:$0xff] }
 0x2bb   :  { %709 = vmatpush.msrb.mxu2 %v2838_v24  ;;  %753 = vmatpush.msra.mxu0 %v2839_v4 }
 0x2bc   :  { %690 = vmatpush.msrb.mxu1 %v2840_v11 }
 0x2bd   :  { %710 = vmatpush.msrb.mxu2 %v2841_v46  ;;  %754 = vmatpush.msra.mxu0 %v1788_v3 }
 0x2be   :  { %691 = vmatpush.msrb.mxu1 %v2842_v16 }
 0x2bf   :  { %711 = vmatpush.msrb.mxu2 %v2843_v50  ;;  %755 = vmatpush.msra.mxu0 %v1800_v8 }
 0x31c   :  { %v527_v60 = vpop.f32.mrf.mxu1 }
 0x31d   :  { %v528_v52 = vadd.f32 %v527_v60, %v506_v22  ;;  %v2847_v22 = vld [vmem:[#allocation32_spill] sm:$0xff] }
 0x31e   :  { %v2853_v60 = vld [vmem:[#allocation36_spill] sm:$0xff] }
 0x31f   :  { %v530_v24 = vadd.f32 %v528_v52, %v2068_v20  ;;  %v2844_v52 = vld [vmem:[#allocation57_spill] sm:$0xff] }
 0x321   :  { %1251 = vtanh.f32 %v530_v24  ;;  %v2855_v24 = vld [vmem:[#allocation38_spill] sm:$0xff] }
 0x327   :  { %v1252_v4 = vpop.eup %1251 }
 0x328   :  { %568 = vmatmul.f32.vlgmr.msrb.gmra.mxu3 %v1252_v4  ;;  %608 = vmatmul.f32.vlgmr.msra.gmra.mxu1 %v1252_v4  ;;  %v2856_v4 = vld [vmem:[#allocation66_spill] sm:$0xff] }
 0x329   :  { %718 = vmatpush.msrb.mxu3 %v2816_v56  ;;  %760 = vmatpush.msra.mxu1 %v1664_v19  ;;  %v2845_v19 = vld [vmem:[#allocation31_spill] sm:$0xff] }
 0x32b   :  { %719 = vmatpush.msrb.mxu3 %v2817_v0  ;;  %761 = vmatpush.msra.mxu1 %v1670_v21  ;;  %v2846_v21 = vld [vmem:[#allocation59_spill] sm:$0xff] }
 0x32d   :  { %720 = vmatpush.msrb.mxu3 %v1831_v5  ;;  %762 = vmatpush.msra.mxu1 %v1674_v23  ;;  %v2848_v23 = vld [vmem:[#allocation60_spill] sm:$0xff] }
 0x32f   :  { %721 = vmatpush.msrb.mxu3 %v2818_v1  ;;  %763 = vmatpush.msra.mxu1 %v1680_v25  ;;  %v2850_v25 = vld [vmem:[#allocation61_spill] sm:$0xff] }
 0x331   :  { %722 = vmatpush.msrb.mxu3 %v2819_v17  ;;  %764 = vmatpush.msra.mxu1 %v1686_v27  ;;  %v2852_v27 = vld [vmem:[#allocation63_spill] sm:$0xff] }
 0x333   :  { %723 = vmatpush.msrb.mxu3 %v1861_v9  ;;  %765 = vmatpush.msra.mxu1 %v1692_v29  ;;  %v2854_v29 = vld [vmem:[#allocation65_spill] sm:$0xff] }
 0x335   :  { %724 = vmatpush.msrb.mxu3 %v2844_v52  ;;  %766 = vmatpush.msra.mxu1 %v2845_v19  ;;  %v549_v19 = vpop.f32.mrf.mxu2 }
 0x337   :  { %725 = vmatpush.msrb.mxu3 %v2846_v21  ;;  %767 = vmatpush.msra.mxu1 %v2847_v22 }
 0x339   :  { %726 = vmatpush.msrb.mxu3 %v2848_v23  ;;  %768 = vmatpush.msra.mxu1 %v2849_v31 }
 0x33b   :  { %727 = vmatpush.msrb.mxu3 %v2850_v25  ;;  %769 = vmatpush.msra.mxu1 %v2851_v47  ;;  %v2857_v47 = vld [vmem:[#allocation18_spill] sm:$0xff] }
 0x33d   :  { %728 = vmatpush.msrb.mxu3 %v2852_v27  ;;  %770 = vmatpush.msra.mxu1 %v2853_v60 }
 0x33f   :  { %729 = vmatpush.msrb.mxu3 %v2854_v29  ;;  %771 = vmatpush.msra.mxu1 %v2855_v24 }
 0x341   :  { %730 = vmatpush.msrb.mxu3 %v2856_v4  ;;  %772 = vmatpush.msra.mxu1 %v2826_v62 }
 0x343   :  { %731 = vmatpush.msrb.mxu3 %v2827_v35  ;;  %773 = vmatpush.msra.mxu1 %v2828_v18 }
 0x345   :  { %732 = vmatpush.msrb.mxu3 %v2829_v38  ;;  %774 = vmatpush.msra.mxu1 %v2830_v55 }
 0x347   :  { %733 = vmatpush.msrb.mxu3 %v2831_v43  ;;  %775 = vmatpush.msra.mxu1 %v2832_v12 }
 0x3ab   :  { %v569_v22 = vpop.f32.mrf.mxu3 }
 0x3ac   :  { %v570_v31 = vadd.f32 %v569_v22, %v549_v19  ;;  %v2311_v19 = vld [vmem:[#allocation2 + $0x1d8] sm:$0xff]  ;;  %v2314_v22 = vld [vmem:[#allocation2 + $0xd0] sm:$0xff] }
 0x3ae   :  { %v612_v60 = vadd.f32 %v570_v31, %v2857_v47  ;;  %v2317_v31 = vld [vmem:[#allocation2 + $0xc8] sm:$0xff] }
 0x3af   :  { %v2320_v47 = vld [vmem:[#allocation2 + $0x1c8] sm:$0xff] }
 0x3b0   :  { %1253 = vtanh.f32 %v612_v60  ;;  %v2323_v60 = vld [vmem:[#allocation2 + $0xc0] sm:$0xff] }
 0x3b6   :  { %v1254_v4 = vpop.eup %1253 }
 0x3b7   :  { %630 = vmatmul.f32.vlgmr.msra.gmra.mxu2 %v1254_v4  ;;  %652 = vmatmul.f32.vlgmr.msra.gmra.mxu3 %v1254_v4 }
 0x3b8   :  { %692 = vmatmul.f32.vlgmr.msrb.gmra.mxu1 %v1254_v4  ;;  %780 = vmatpush.msra.mxu2 %v1720_v39  ;;  %v2863_v39 = vld [vmem:[#allocation55_spill] sm:$0xff]  ;;  %v2308_v4 = vld [vmem:[#allocation2 + $0xd8] sm:$0xff] }
 0x3b9   :  { %800 = vmatpush.msra.mxu3 %v1700_v32  ;;  %844 = vmatpush.msrb.mxu1 %v2807_v57  ;;  %v2859_v32 = vld [vmem:[#allocation35_spill] sm:$0xff] }
 0x3ba   :  { %781 = vmatpush.msra.mxu2 %v1726_v41  ;;  %v2866_v41 = vld [vmem:[#allocation58_spill] sm:$0xff] }
 0x3bb   :  { %801 = vmatpush.msra.mxu3 %v1704_v33  ;;  %845 = vmatpush.msrb.mxu1 %v2809_v10  ;;  %v2860_v33 = vld [vmem:[#allocation52_spill] sm:$0xff] }
 0x3bc   :  { %782 = vmatpush.msra.mxu2 %v1738_v45  ;;  %v609_v45 = vpop.f32.mrf.mxu1 }
 0x3bd   :  { %802 = vmatpush.msra.mxu3 %v1713_v36  ;;  %846 = vmatpush.msrb.mxu1 %v2810_v61  ;;  %v2862_v36 = vld [vmem:[#allocation37_spill] sm:$0xff]  ;;  %v2244_v61 = vld [vmem:[#allocation2 + $0x1d0] sm:$0xff] }
 0x3be   :  { %783 = vmatpush.msra.mxu2 %v1750_v49 }
 0x3bf   :  { %803 = vmatpush.msra.mxu3 %v1724_v40  ;;  %847 = vmatpush.msrb.mxu1 %v2812_v26  ;;  %v2865_v40 = vld [vmem:[#allocation39_spill] sm:$0xff] }
 0x3c0   :  { %784 = vmatpush.msra.mxu2 %v1762_v54 }
 0x3c1   :  { %804 = vmatpush.msra.mxu3 %v1736_v44  ;;  %848 = vmatpush.msrb.mxu1 %v2813_v28  ;;  %v2868_v44 = vld [vmem:[#allocation41_spill] sm:$0xff]  ;;  %v2870_v28 = vld [vmem:[#allocation20_spill] sm:$0xff] }
 0x3c2   :  { %785 = vmatpush.msra.mxu2 %v1774_v59  ;;  %v2240_v59 = vld [vmem:[#allocation2 + $0x1e0] sm:$0xff] }
 0x3c3   :  { %805 = vmatpush.msra.mxu3 %v1748_v48  ;;  %849 = vmatpush.msrb.mxu1 %v2814_v51  ;;  %v589_v48 = vpop.f32.mrf.mxu0 }
 0x3c4   :  { %786 = vmatpush.msra.mxu2 %v1786_v2  ;;  %v610_v49 = vadd.f32 %v609_v45, %v589_v48  ;;  %v2256_v2 = vld [vmem:[#allocation2 + $0x1a0] sm:$0xff]  ;;  %v2344_v45 = vld [vmem:[#allocation2 + $0x98] sm:$0xff] }
 0x3c5   :  { %806 = vmatpush.msra.mxu3 %v1760_v53  ;;  %850 = vmatpush.msrb.mxu1 %v1696_v30  ;;  %v2858_v30 = vld [vmem:[#allocation45_spill] sm:$0xff]  ;;  %v2347_v48 = vld [vmem:[#allocation2 + $0x198] sm:$0xff] }
 0x3c6   :  { %787 = vmatpush.msra.mxu2 %v1798_v7  ;;  %v2276_v7 = vld [vmem:[#allocation2 + $0x150] sm:$0xff] }
 0x3c7   :  { %807 = vmatpush.msra.mxu3 %v1772_v58  ;;  %851 = vmatpush.msrb.mxu1 %v1706_v34  ;;  %v2861_v34 = vld [vmem:[#allocation47_spill] sm:$0xff] }
 0x3c8   :  { %788 = vmatpush.msra.mxu2 %v1816_v14  ;;  %v2236_v58 = vld [vmem:[#allocation2 + $0x1f0] sm:$0xff] }
 0x3c9   :  { %808 = vmatpush.msra.mxu3 %v1784_v63  ;;  %852 = vmatpush.msrb.mxu1 %v1715_v37  ;;  %v2864_v37 = vld [vmem:[#allocation49_spill] sm:$0xff] }
 0x3ca   :  { %789 = vmatpush.msra.mxu2 %v1826_v13  ;;  %v2248_v63 = vld [vmem:[#allocation2 + $0x1c0] sm:$0xff] }
 0x3cb   :  { %809 = vmatpush.msra.mxu3 %v1796_v6  ;;  %853 = vmatpush.msrb.mxu1 %v1728_v42  ;;  %v2867_v42 = vld [vmem:[#allocation50_spill] sm:$0xff]  ;;  %v2268_v6 = vld [vmem:[#allocation2 + $0x170] sm:$0xff] }
 0x3cc   :  { %790 = vmatpush.msra.mxu2 %v1836_v15 }
 0x3cd   :  { %810 = vmatpush.msra.mxu3 %v2858_v30  ;;  %854 = vmatpush.msrb.mxu1 %v2859_v32  ;;  %v2326_v30 = vld [vmem:[#allocation2 + $0xb8] sm:$0xff] }
 0x3ce   :  { %791 = vmatpush.msra.mxu2 %v2860_v33  ;;  %v2329_v32 = vld [vmem:[#allocation2 + $0x1b8] sm:$0xff] }
 0x3cf   :  { %811 = vmatpush.msra.mxu3 %v2861_v34  ;;  %855 = vmatpush.msrb.mxu1 %v2862_v36  ;;  %v2332_v34 = vld [vmem:[#allocation2 + $0xb0] sm:$0xff]  ;;  %v2335_v36 = vld [vmem:[#allocation2 + $0xa8] sm:$0xff] }
 0x3d0   :  { %792 = vmatpush.msra.mxu2 %v2863_v39 }
 0x3d1   :  { %812 = vmatpush.msra.mxu3 %v2864_v37  ;;  %856 = vmatpush.msrb.mxu1 %v2865_v40  ;;  %v2338_v40 = vld [vmem:[#allocation2 + $0x1a8] sm:$0xff] }
 0x3d2   :  { %793 = vmatpush.msra.mxu2 %v2866_v41 }
 0x3d3   :  { %813 = vmatpush.msra.mxu3 %v2867_v42  ;;  %857 = vmatpush.msrb.mxu1 %v2868_v44  ;;  %v2341_v44 = vld [vmem:[#allocation2 + $0xa0] sm:$0xff] }
 0x3d4   :  { %794 = vmatpush.msra.mxu2 %v2840_v11 }
 0x3d5   :  { %814 = vmatpush.msra.mxu3 %v2841_v46  ;;  %858 = vmatpush.msrb.mxu1 %v1788_v3  ;;  %v2264_v3 = vld [vmem:[#allocation2 + $0x180] sm:$0xff] }
 0x3d6   :  { %795 = vmatpush.msra.mxu2 %v2842_v16 }
 0x3d7   :  { %815 = vmatpush.msra.mxu3 %v2843_v50  ;;  %859 = vmatpush.msrb.mxu1 %v1800_v8  ;;  %v2869_v8 = vld [vmem:[#allocation66_spill] sm:$0xff] }
 0x43a   :  { %v631_v51 = vpop.f32.mrf.mxu2  ;;  %v653_v10 = vpop.f32.mrf.mxu3 }
 0x43b   :  { %v632_v53 = vadd.f32 %v631_v51, %v610_v49  ;;  %v2350_v49 = vld [vmem:[#allocation2 + $0x90] sm:$0xff]  ;;  %v2353_v51 = vld [vmem:[#allocation2 + $0x88] sm:$0xff] }
 0x43d   :  { %v634_v54 = vadd.f32 %v632_v53, %v2068_v20  ;;  %v2356_v53 = vld [vmem:[#allocation2 + $0x188] sm:$0xff] }
 0x43f   :  { %1255 = vtanh.f32 %v634_v54  ;;  %v2359_v54 = vld [vmem:[#allocation2 + $0x80] sm:$0xff] }
 0x445   :  { %v1256_v57 = vpop.eup %1255 }
 0x446   :  { %672 = vmatmul.f32.vlgmr.msrb.gmra.mxu0 %v1256_v57  ;;  %712 = vmatmul.f32.vlgmr.msrb.gmra.mxu2 %v1256_v57  ;;  %v2363_v57 = vld [vmem:[#allocation2 + $0x178] sm:$0xff] }
 0x447   :  { %822 = vmatpush.msrb.mxu0 %v2816_v56  ;;  %864 = vmatpush.msrb.mxu2 %v2236_v58  ;;  %v2252_v56 = vld [vmem:[#allocation2 + $0x1b0] sm:$0xff] }
 0x449   :  { %823 = vmatpush.msrb.mxu0 %v2817_v0  ;;  %865 = vmatpush.msrb.mxu2 %v2240_v59 }
 0x44b   :  { %824 = vmatpush.msrb.mxu0 %v1831_v5  ;;  %866 = vmatpush.msrb.mxu2 %v2244_v61  ;;  %v2260_v5 = vld [vmem:[#allocation2 + $0x190] sm:$0xff] }
 0x44d   :  { %825 = vmatpush.msrb.mxu0 %v2818_v1  ;;  %867 = vmatpush.msrb.mxu2 %v2248_v63 }
 0x44f   :  { %826 = vmatpush.msrb.mxu0 %v2819_v17  ;;  %868 = vmatpush.msrb.mxu2 %v2252_v56 }
 0x451   :  { %827 = vmatpush.msrb.mxu0 %v1861_v9  ;;  %869 = vmatpush.msrb.mxu2 %v2256_v2  ;;  %v2272_v9 = vld [vmem:[#allocation2 + $0x160] sm:$0xff] }
 0x453   :  { %828 = vmatpush.msrb.mxu0 %v2844_v52  ;;  %870 = vmatpush.msrb.mxu2 %v2260_v5  ;;  %v2302_v52 = vld [vmem:[#allocation2 + $0x1e8] sm:$0xff] }
 0x455   :  { %829 = vmatpush.msrb.mxu0 %v2846_v21  ;;  %871 = vmatpush.msrb.mxu2 %v2264_v3 }
 0x457   :  { %830 = vmatpush.msrb.mxu0 %v2848_v23  ;;  %872 = vmatpush.msrb.mxu2 %v2268_v6 }
 0x459   :  { %831 = vmatpush.msrb.mxu0 %v2850_v25  ;;  %873 = vmatpush.msrb.mxu2 %v2272_v9 }
 0x45b   :  { %832 = vmatpush.msrb.mxu0 %v2852_v27  ;;  %874 = vmatpush.msrb.mxu2 %v2276_v7 }
 0x45d   :  { %833 = vmatpush.msrb.mxu0 %v2854_v29  ;;  %875 = vmatpush.msrb.mxu2 %v2855_v24  ;;  %v2305_v24 = vld [vmem:[#allocation2 + $0xe0] sm:$0xff] }
 0x45f   :  { %834 = vmatpush.msrb.mxu0 %v2869_v8  ;;  %876 = vmatpush.msrb.mxu2 %v2826_v62  ;;  %v2290_v62 = vld [vmem:[#allocation2 + $0xf8] sm:$0xff] }
 0x461   :  { %835 = vmatpush.msrb.mxu0 %v2827_v35  ;;  %877 = vmatpush.msrb.mxu2 %v2828_v18  ;;  %v2293_v18 = vld [vmem:[#allocation2 + $0x1f8] sm:$0xff] }
 0x463   :  { %836 = vmatpush.msrb.mxu0 %v2829_v38  ;;  %878 = vmatpush.msrb.mxu2 %v2830_v55  ;;  %v2296_v55 = vld [vmem:[#allocation2 + $0xf0] sm:$0xff] }
 0x465   :  { %837 = vmatpush.msrb.mxu0 %v2831_v43  ;;  %879 = vmatpush.msrb.mxu2 %v2832_v12  ;;  %v2299_v12 = vld [vmem:[#allocation2 + $0xe8] sm:$0xff] }
 0x4c3   :  { %v673_v0 = vpop.f32.mrf.mxu0 }
 0x4c4   :  { %v674_v26 = vadd.f32 %v673_v0, %v653_v10  ;;  %v2366_v10 = vld [vmem:[#allocation2 + $0x70] sm:$0xff]  ;;  %v2370_v0 = vld [vmem:[#allocation2 + $0x168] sm:$0xff] }
 0x4c6   :  { %v716_v1 = vadd.f32 %v674_v26, %v2870_v28  ;;  %v2373_v26 = vld [vmem:[#allocation2 + $0x60] sm:$0xff]  ;;  %v2380_v28 = vld [vmem:[#allocation2 + $0x50] sm:$0xff] }
 0x4c8   :  { %1257 = vtanh.f32 %v716_v1  ;;  %v2387_v1 = vld [vmem:[#allocation2 + $0x40] sm:$0xff] }
 0x4ce   :  { %v1258_v17 = vpop.eup %1257 }
 0x4cf   :  { %734 = vmatmul.f32.vlgmr.msrb.gmra.mxu3 %v1258_v17  ;;  %756 = vmatmul.f32.vlgmr.msra.gmra.mxu0 %v1258_v17 }
 0x4d0   :  { %796 = vmatmul.f32.vlgmr.msra.gmra.mxu2 %v1258_v17  ;;  %884 = vmatpush.msrb.mxu3 %v2290_v62  ;;  %v2402_v17 = vld [vmem:[#allocation2 + $0x10] sm:$0xff] }
 0x4d1   :  { %904 = vmatpush.msra.mxu0 %v2293_v18  ;;  %948 = vmatpush.msra.mxu2 %v2296_v55  ;;  %2873 = vst [vmem:[#allocation27_spill] sm:$0xff] %v2402_v17 }
 0x4d2   :  { %885 = vmatpush.msrb.mxu3 %v2299_v12 }
 0x4d3   :  { %905 = vmatpush.msra.mxu0 %v2302_v52  ;;  %949 = vmatpush.msra.mxu2 %v2305_v24 }
 0x4d4   :  { %886 = vmatpush.msrb.mxu3 %v2308_v4 }
 0x4d5   :  { %906 = vmatpush.msra.mxu0 %v2311_v19  ;;  %950 = vmatpush.msra.mxu2 %v2314_v22 }
 0x4d6   :  { %887 = vmatpush.msrb.mxu3 %v2317_v31 }
 0x4d7   :  { %907 = vmatpush.msra.mxu0 %v2320_v47  ;;  %951 = vmatpush.msra.mxu2 %v2323_v60 }
 0x4d8   :  { %888 = vmatpush.msrb.mxu3 %v2326_v30 }
 0x4d9   :  { %908 = vmatpush.msra.mxu0 %v2329_v32  ;;  %952 = vmatpush.msra.mxu2 %v2332_v34 }
 0x4da   :  { %889 = vmatpush.msrb.mxu3 %v2335_v36 }
 0x4db   :  { %909 = vmatpush.msra.mxu0 %v2338_v40  ;;  %953 = vmatpush.msra.mxu2 %v2341_v44 }
 0x4dc   :  { %890 = vmatpush.msrb.mxu3 %v2344_v45 }
 0x4dd   :  { %910 = vmatpush.msra.mxu0 %v2347_v48  ;;  %954 = vmatpush.msra.mxu2 %v2350_v49 }
 0x4de   :  { %891 = vmatpush.msrb.mxu3 %v2353_v51 }
 0x4df   :  { %911 = vmatpush.msra.mxu0 %v2356_v53  ;;  %955 = vmatpush.msra.mxu2 %v2359_v54 }
 0x4e0   :  { %892 = vmatpush.msrb.mxu3 %v1816_v14  ;;  %v2377_v14 = vld [vmem:[#allocation2 + $0x158] sm:$0xff] }
 0x4e1   :  { %912 = vmatpush.msra.mxu0 %v2363_v57  ;;  %956 = vmatpush.msra.mxu2 %v2366_v10 }
 0x4e2   :  { %893 = vmatpush.msrb.mxu3 %v1826_v13  ;;  %v2384_v13 = vld [vmem:[#allocation2 + $0x148] sm:$0xff] }
 0x4e3   :  { %913 = vmatpush.msra.mxu0 %v2370_v0  ;;  %957 = vmatpush.msra.mxu2 %v2373_v26 }
 0x4e4   :  { %894 = vmatpush.msrb.mxu3 %v1836_v15  ;;  %v2392_v15 = vld [vmem:[#allocation2 + $0x30] sm:$0xff] }
 0x4e5   :  { %914 = vmatpush.msra.mxu0 %v2377_v14  ;;  %958 = vmatpush.msra.mxu2 %v2380_v28  ;;  %2871 = vst [vmem:[#allocation25_spill] sm:$0xff] %v2392_v15 }
 0x4e6   :  { %895 = vmatpush.msrb.mxu3 %v2860_v33  ;;  %v2397_v33 = vld [vmem:[#allocation2 + $0x20] sm:$0xff] }
 0x4e7   :  { %915 = vmatpush.msra.mxu0 %v2384_v13  ;;  %959 = vmatpush.msra.mxu2 %v2387_v1  ;;  %2872 = vst [vmem:[#allocation26_spill] sm:$0xff] %v2397_v33 }
 0x4e8   :  { %896 = vmatpush.msrb.mxu3 %v2863_v39  ;;  %v2407_v39 = vld [vmem:[#allocation2] sm:$0xff] }
 0x4e9   :  { %916 = vmatpush.msra.mxu0 %v2864_v37  ;;  %960 = vmatpush.msra.mxu2 %v2392_v15  ;;  %v713_v37 = vpop.f32.mrf.mxu2 }
 0x4ea   :  { %897 = vmatpush.msrb.mxu3 %v2866_v41  ;;  %v693_v41 = vpop.f32.mrf.mxu1 }
 0x4eb   :  { %917 = vmatpush.msra.mxu0 %v2867_v42  ;;  %961 = vmatpush.msra.mxu2 %v2397_v33  ;;  %v714_v42 = vadd.f32 %v713_v37, %v693_v41  ;;  %v2431_v37 = vld [vmem:[#allocation3 + $0x50] sm:$0xff]  ;;  %v2435_v41 = vld [vmem:[#allocation3 + $0x48] sm:$0xff] }
 0x4ec   :  { %898 = vmatpush.msrb.mxu3 %v2840_v11 }
 0x4ed   :  { %918 = vmatpush.msra.mxu0 %v2841_v46  ;;  %962 = vmatpush.msra.mxu2 %v2402_v17  ;;  %v2411_v17 = vld [vmem:[#allocation3 + $0x78] sm:$0xff] }
 0x4ee   :  { %899 = vmatpush.msrb.mxu3 %v2842_v16  ;;  %v2419_v16 = vld [vmem:[#allocation3 + $0x68] sm:$0xff] }
 0x4ef   :  { %919 = vmatpush.msra.mxu0 %v2843_v50  ;;  %963 = vmatpush.msra.mxu2 %v2407_v39  ;;  %v2415_v50 = vld [vmem:[#allocation3 + $0x70] sm:$0xff] }
 0x552   :  { %v735_v33 = vpop.f32.mrf.mxu3 }
 0x553   :  { %v736_v15 = vadd.f32 %v735_v33, %v714_v42  ;;  %v2427_v33 = vld [vmem:[#allocation3 + $0x58] sm:$0xff]  ;;  %v2448_v42 = vld [vmem:[#allocation2 + $0x140] sm:$0xff] }
 0x555   :  { %v738_v11 = vadd.f32 %v736_v15, %v2068_v20  ;;  %v2423_v15 = vld [vmem:[#allocation3 + $0x60] sm:$0xff] }
 0x557   :  { %1259 = vtanh.f32 %v738_v11 }
 0x55d   :  { %v1260_v46 = vpop.eup %1259 }
 0x55e   :  { %776 = vmatmul.f32.vlgmr.msra.gmra.mxu1 %v1260_v46  ;;  %816 = vmatmul.f32.vlgmr.msra.gmra.mxu3 %v1260_v46 }
 0x55f   :  { %926 = vmatpush.msra.mxu1 %v2411_v17  ;;  %968 = vmatpush.msra.mxu3 %v2236_v58 }
 0x561   :  { %927 = vmatpush.msra.mxu1 %v2415_v50  ;;  %969 = vmatpush.msra.mxu3 %v2240_v59 }
 0x563   :  { %928 = vmatpush.msra.mxu1 %v2419_v16  ;;  %970 = vmatpush.msra.mxu3 %v2244_v61 }
 0x565   :  { %929 = vmatpush.msra.mxu1 %v2423_v15  ;;  %971 = vmatpush.msra.mxu3 %v2248_v63 }
 0x567   :  { %930 = vmatpush.msra.mxu1 %v2427_v33  ;;  %972 = vmatpush.msra.mxu3 %v2252_v56 }
 0x569   :  { %931 = vmatpush.msra.mxu1 %v2431_v37  ;;  %973 = vmatpush.msra.mxu3 %v2256_v2 }
 0x56b   :  { %932 = vmatpush.msra.mxu1 %v2435_v41  ;;  %974 = vmatpush.msra.mxu3 %v2260_v5 }
 0x56d   :  { %933 = vmatpush.msra.mxu1 %v2846_v21  ;;  %975 = vmatpush.msra.mxu3 %v2264_v3  ;;  %v2452_v21 = vld [vmem:[#allocation2 + $0x130] sm:$0xff] }
 0x56e   :  { %2874 = vst [vmem:[#allocation28_spill] sm:$0xff] %v2452_v21 }
 0x56f   :  { %934 = vmatpush.msra.mxu1 %v2848_v23  ;;  %976 = vmatpush.msra.mxu3 %v2268_v6  ;;  %v2456_v23 = vld [vmem:[#allocation2 + $0x120] sm:$0xff] }
 0x571   :  { %935 = vmatpush.msra.mxu1 %v2850_v25  ;;  %977 = vmatpush.msra.mxu3 %v2272_v9  ;;  %v2460_v25 = vld [vmem:[#allocation2 + $0x110] sm:$0xff] }
 0x573   :  { %936 = vmatpush.msra.mxu1 %v2852_v27  ;;  %978 = vmatpush.msra.mxu3 %v2276_v7  ;;  %v2464_v27 = vld [vmem:[#allocation2 + $0x100] sm:$0xff] }
 0x575   :  { %937 = vmatpush.msra.mxu1 %v2854_v29  ;;  %979 = vmatpush.msra.mxu3 %v2448_v42  ;;  %v757_v29 = vpop.f32.mrf.mxu0 }
 0x577   :  { %938 = vmatpush.msra.mxu1 %v2869_v8  ;;  %980 = vmatpush.msra.mxu3 %v2452_v21 }
 0x579   :  { %939 = vmatpush.msra.mxu1 %v2827_v35  ;;  %981 = vmatpush.msra.mxu3 %v2456_v23  ;;  %v2875_v35 = vld [vmem:[#allocation21_spill] sm:$0xff] }
 0x57b   :  { %940 = vmatpush.msra.mxu1 %v2829_v38  ;;  %982 = vmatpush.msra.mxu3 %v2460_v25  ;;  %v2492_v38 = vld [vmem:[#allocation2 + $0x78] sm:$0xff] }
 0x57d   :  { %941 = vmatpush.msra.mxu1 %v2831_v43  ;;  %983 = vmatpush.msra.mxu3 %v2464_v27  ;;  %v2497_v43 = vld [vmem:[#allocation2 + $0x68] sm:$0xff] }
 0x5db   :  { %v777_v8 = vpop.f32.mrf.mxu1 }
 0x5dc   :  { %v778_v11 = vadd.f32 %v777_v8, %v757_v29  ;;  %v797_v8 = vpop.f32.mrf.mxu2 }
 0x5de   :  { %v820_v46 = vadd.f32 %v778_v11, %v2875_v35 }
 0x5e0   :  { %1261 = vtanh.f32 %v820_v46 }
 0x5e1   :  { %v817_v29 = vpop.f32.mrf.mxu3 }
 0x5e2   :  { %v818_v11 = vadd.f32 %v817_v29, %v797_v8 }
 0x5e6   :  { %v1262_v21 = vpop.eup %1261 }
 0x5e7   :  { %838 = vmatmul.f32.vlgmr.msrb.gmra.mxu0 %v1262_v21  ;;  %860 = vmatmul.f32.vlgmr.msrb.gmra.mxu1 %v1262_v21 }
 0x5e8   :  { %900 = vmatmul.f32.vlgmr.msrb.gmra.mxu3 %v1262_v21  ;;  %988 = vmatpush.msrb.mxu0 %v2290_v62  ;;  %v2536_v21 = vld [vmem:[#allocation2 + $0x108] sm:$0xff] }
 0x5e9   :  { %1008 = vmatpush.msrb.mxu1 %v2293_v18  ;;  %1052 = vmatpush.msrb.mxu3 %v2296_v55  ;;  %v2502_v55 = vld [vmem:[#allocation2 + $0x58] sm:$0xff] }
 0x5ea   :  { %989 = vmatpush.msrb.mxu0 %v2299_v12 }
 0x5eb   :  { %1009 = vmatpush.msrb.mxu1 %v2302_v52  ;;  %1053 = vmatpush.msrb.mxu3 %v2305_v24  ;;  %v2507_v24 = vld [vmem:[#allocation2 + $0x48] sm:$0xff] }
 0x5ec   :  { %990 = vmatpush.msrb.mxu0 %v2308_v4 }
 0x5ed   :  { %1010 = vmatpush.msrb.mxu1 %v2311_v19  ;;  %1054 = vmatpush.msrb.mxu3 %v2314_v22  ;;  %v2512_v22 = vld [vmem:[#allocation2 + $0x38] sm:$0xff] }
 0x5ee   :  { %991 = vmatpush.msrb.mxu0 %v2317_v31 }
 0x5ef   :  { %1011 = vmatpush.msrb.mxu1 %v2320_v47  ;;  %1055 = vmatpush.msrb.mxu3 %v2323_v60  ;;  %v2515_v60 = vld [vmem:[#allocation2 + $0x138] sm:$0xff] }
 0x5f0   :  { %992 = vmatpush.msrb.mxu0 %v2326_v30 }
 0x5f1   :  { %1012 = vmatpush.msrb.mxu1 %v2329_v32  ;;  %1056 = vmatpush.msrb.mxu3 %v2332_v34  ;;  %v2876_v34 = vld [vmem:[#allocation25_spill] sm:$0xff] }
 0x5f2   :  { %993 = vmatpush.msrb.mxu0 %v2335_v36 }
 0x5f3   :  { %1013 = vmatpush.msrb.mxu1 %v2338_v40  ;;  %1057 = vmatpush.msrb.mxu3 %v2341_v44  ;;  %v2519_v44 = vld [vmem:[#allocation2 + $0x28] sm:$0xff] }
 0x5f4   :  { %994 = vmatpush.msrb.mxu0 %v2344_v45 }
 0x5f5   :  { %1014 = vmatpush.msrb.mxu1 %v2347_v48  ;;  %1058 = vmatpush.msrb.mxu3 %v2350_v49  ;;  %v2522_v49 = vld [vmem:[#allocation2 + $0x128] sm:$0xff] }
 0x5f6   :  { %995 = vmatpush.msrb.mxu0 %v2353_v51 }
 0x5f7   :  { %1015 = vmatpush.msrb.mxu1 %v2356_v53  ;;  %1059 = vmatpush.msrb.mxu3 %v2359_v54  ;;  %v2877_v54 = vld [vmem:[#allocation26_spill] sm:$0xff] }
 0x5f8   :  { %996 = vmatpush.msrb.mxu0 %v2492_v38 }
 0x5f9   :  { %1016 = vmatpush.msrb.mxu1 %v2363_v57  ;;  %1060 = vmatpush.msrb.mxu3 %v2366_v10  ;;  %v2526_v10 = vld [vmem:[#allocation2 + $0x18] sm:$0xff] }
 0x5fa   :  { %997 = vmatpush.msrb.mxu0 %v2497_v43 }
 0x5fb   :  { %1017 = vmatpush.msrb.mxu1 %v2370_v0  ;;  %1061 = vmatpush.msrb.mxu3 %v2373_v26  ;;  %v2529_v26 = vld [vmem:[#allocation2 + $0x118] sm:$0xff] }
 0x5fc   :  { %998 = vmatpush.msrb.mxu0 %v2502_v55 }
 0x5fd   :  { %1018 = vmatpush.msrb.mxu1 %v2377_v14  ;;  %1062 = vmatpush.msrb.mxu3 %v2380_v28  ;;  %v2878_v28 = vld [vmem:[#allocation27_spill] sm:$0xff] }
 0x5fe   :  { %999 = vmatpush.msrb.mxu0 %v2507_v24 }
 0x5ff   :  { %1019 = vmatpush.msrb.mxu1 %v2384_v13  ;;  %1063 = vmatpush.msrb.mxu3 %v2387_v1  ;;  %v2533_v1 = vld [vmem:[#allocation2 + $0x8] sm:$0xff] }
 0x600   :  { %1000 = vmatpush.msrb.mxu0 %v2512_v22 }
 0x601   :  { %1020 = vmatpush.msrb.mxu1 %v2515_v60  ;;  %1064 = vmatpush.msrb.mxu3 %v2876_v34 }
 0x602   :  { %1001 = vmatpush.msrb.mxu0 %v2519_v44 }
 0x603   :  { %1021 = vmatpush.msrb.mxu1 %v2522_v49  ;;  %1065 = vmatpush.msrb.mxu3 %v2877_v54 }
 0x604   :  { %1002 = vmatpush.msrb.mxu0 %v2526_v10 }
 0x605   :  { %1022 = vmatpush.msrb.mxu1 %v2529_v26  ;;  %1066 = vmatpush.msrb.mxu3 %v2878_v28  ;;  %v2880_v28 = vld [vmem:[#allocation22_spill] sm:$0xff] }
 0x606   :  { %1003 = vmatpush.msrb.mxu0 %v2533_v1 }
 0x607   :  { %1023 = vmatpush.msrb.mxu1 %v2536_v21  ;;  %1067 = vmatpush.msrb.mxu3 %v2407_v39 }
 0x664   :  { %v839_v35 = vpop.f32.mrf.mxu0 }
 0x665   :  { %v840_v46 = vadd.f32 %v839_v35, %v818_v11 }
 0x667   :  { %v842_v34 = vadd.f32 %v840_v46, %v2068_v20 }
 0x669   :  { %1263 = vtanh.f32 %v842_v34 }
 0x66f   :  { %v1264_v54 = vpop.eup %1263 }
 0x670   :  { %880 = vmatmul.f32.vlgmr.msrb.gmra.mxu2 %v1264_v54  ;;  %920 = vmatmul.f32.vlgmr.msra.gmra.mxu0 %v1264_v54 }
 0x671   :  { %1030 = vmatpush.msrb.mxu2 %v2411_v17  ;;  %1072 = vmatpush.msra.mxu0 %v2236_v58  ;;  %v2555_v58 = vld [vmem:[#allocation3 + $0x40] sm:$0xff] }
 0x673   :  { %1031 = vmatpush.msrb.mxu2 %v2415_v50  ;;  %1073 = vmatpush.msra.mxu0 %v2240_v59  ;;  %v2559_v59 = vld [vmem:[#allocation3 + $0x38] sm:$0xff] }
 0x675   :  { %1032 = vmatpush.msrb.mxu2 %v2419_v16  ;;  %1074 = vmatpush.msra.mxu0 %v2244_v61  ;;  %v2563_v61 = vld [vmem:[#allocation3 + $0x30] sm:$0xff] }
 0x677   :  { %1033 = vmatpush.msrb.mxu2 %v2423_v15  ;;  %1075 = vmatpush.msra.mxu0 %v2248_v63  ;;  %v2567_v63 = vld [vmem:[#allocation3 + $0x28] sm:$0xff] }
 0x679   :  { %1034 = vmatpush.msrb.mxu2 %v2427_v33  ;;  %1076 = vmatpush.msra.mxu0 %v2252_v56  ;;  %v2571_v56 = vld [vmem:[#allocation3 + $0x20] sm:$0xff] }
 0x67b   :  { %1035 = vmatpush.msrb.mxu2 %v2431_v37  ;;  %1077 = vmatpush.msra.mxu0 %v2256_v2  ;;  %v2575_v2 = vld [vmem:[#allocation3 + $0x18] sm:$0xff] }
 0x67d   :  { %1036 = vmatpush.msrb.mxu2 %v2435_v41  ;;  %1078 = vmatpush.msra.mxu0 %v2260_v5  ;;  %v2879_v5 = vld [vmem:[#allocation28_spill] sm:$0xff] }
 0x67f   :  { %1037 = vmatpush.msrb.mxu2 %v2555_v58  ;;  %1079 = vmatpush.msra.mxu0 %v2264_v3  ;;  %v2579_v3 = vld [vmem:[#allocation3 + $0x10] sm:$0xff] }
 0x681   :  { %1038 = vmatpush.msrb.mxu2 %v2559_v59  ;;  %1080 = vmatpush.msra.mxu0 %v2268_v6  ;;  %v2583_v6 = vld [vmem:[#allocation3 + $0x8] sm:$0xff] }
 0x683   :  { %1039 = vmatpush.msrb.mxu2 %v2563_v61  ;;  %1081 = vmatpush.msra.mxu0 %v2272_v9  ;;  %v2587_v9 = vld [vmem:[#allocation3] sm:$0xff] }
 0x685   :  { %1040 = vmatpush.msrb.mxu2 %v2567_v63  ;;  %1082 = vmatpush.msra.mxu0 %v2276_v7  ;;  %v861_v7 = vpop.f32.mrf.mxu1 }
 0x687   :  { %1041 = vmatpush.msrb.mxu2 %v2571_v56  ;;  %1083 = vmatpush.msra.mxu0 %v2448_v42 }
 0x689   :  { %1042 = vmatpush.msrb.mxu2 %v2575_v2  ;;  %1084 = vmatpush.msra.mxu0 %v2879_v5 }
 0x68b   :  { %1043 = vmatpush.msrb.mxu2 %v2579_v3  ;;  %1085 = vmatpush.msra.mxu0 %v2456_v23 }
 0x68d   :  { %1044 = vmatpush.msrb.mxu2 %v2583_v6  ;;  %1086 = vmatpush.msra.mxu0 %v2460_v25 }
 0x68f   :  { %1045 = vmatpush.msrb.mxu2 %v2587_v9  ;;  %1087 = vmatpush.msra.mxu0 %v2464_v27 }
 0x6f3   :  { %v881_v39 = vpop.f32.mrf.mxu2 }
 0x6f4   :  { %v882_v42 = vadd.f32 %v881_v39, %v861_v7 }
 0x6f6   :  { %v924_v29 = vadd.f32 %v882_v42, %v2880_v28 }
 0x6f8   :  { %1265 = vtanh.f32 %v924_v29 }
 0x6fe   :  { %v1266_v8 = vpop.eup %1265 }
 0x6ff   :  { %942 = vmatmul.f32.vlgmr.msra.gmra.mxu1 %v1266_v8  ;;  %964 = vmatmul.f32.vlgmr.msra.gmra.mxu2 %v1266_v8 }
 0x700   :  { %1004 = vmatmul.f32.vlgmr.msrb.gmra.mxu0 %v1266_v8  ;;  %1092 = vmatpush.msra.mxu1 %v2290_v62  ;;  %v921_v62 = vpop.f32.mrf.mxu0 }
 0x701   :  { %1112 = vmatpush.msra.mxu2 %v2293_v18  ;;  %v901_v18 = vpop.f32.mrf.mxu3 }
 0x702   :  { %1093 = vmatpush.msra.mxu1 %v2299_v12  ;;  %v922_v12 = vadd.f32 %v921_v62, %v901_v18 }
 0x703   :  { %1113 = vmatpush.msra.mxu2 %v2302_v52 }
 0x704   :  { %1094 = vmatpush.msra.mxu1 %v2308_v4 }
 0x705   :  { %1114 = vmatpush.msra.mxu2 %v2311_v19 }
 0x706   :  { %1095 = vmatpush.msra.mxu1 %v2317_v31 }
 0x707   :  { %1115 = vmatpush.msra.mxu2 %v2320_v47 }
 0x708   :  { %1096 = vmatpush.msra.mxu1 %v2326_v30 }
 0x709   :  { %1116 = vmatpush.msra.mxu2 %v2329_v32 }
 0x70a   :  { %1097 = vmatpush.msra.mxu1 %v2335_v36  ;;  %v2881_v36 = vld [vmem:[#allocation23_spill] sm:$0xff] }
 0x70b   :  { %1117 = vmatpush.msra.mxu2 %v2338_v40 }
 0x70c   :  { %1098 = vmatpush.msra.mxu1 %v2344_v45 }
 0x70d   :  { %1118 = vmatpush.msra.mxu2 %v2347_v48 }
 0x70e   :  { %1099 = vmatpush.msra.mxu1 %v2353_v51 }
 0x70f   :  { %1119 = vmatpush.msra.mxu2 %v2356_v53 }
 0x710   :  { %1100 = vmatpush.msra.mxu1 %v2492_v38 }
 0x711   :  { %1120 = vmatpush.msra.mxu2 %v2363_v57 }
 0x712   :  { %1101 = vmatpush.msra.mxu1 %v2497_v43 }
 0x713   :  { %1121 = vmatpush.msra.mxu2 %v2370_v0 }
 0x714   :  { %1102 = vmatpush.msra.mxu1 %v2502_v55 }
 0x715   :  { %1122 = vmatpush.msra.mxu2 %v2377_v14 }
 0x716   :  { %1103 = vmatpush.msra.mxu1 %v2507_v24 }
 0x717   :  { %1123 = vmatpush.msra.mxu2 %v2384_v13 }
 0x718   :  { %1104 = vmatpush.msra.mxu1 %v2512_v22 }
 0x719   :  { %1124 = vmatpush.msra.mxu2 %v2515_v60 }
 0x71a   :  { %1105 = vmatpush.msra.mxu1 %v2519_v44 }
 0x71b   :  { %1125 = vmatpush.msra.mxu2 %v2522_v49 }
 0x71c   :  { %1106 = vmatpush.msra.mxu1 %v2526_v10 }
 0x71d   :  { %1126 = vmatpush.msra.mxu2 %v2529_v26 }
 0x71e   :  { %1107 = vmatpush.msra.mxu1 %v2533_v1 }
 0x71f   :  { %1127 = vmatpush.msra.mxu2 %v2536_v21 }
 0x77c   :  { %v943_v52 = vpop.f32.mrf.mxu1 }
 0x77d   :  { %v944_v4 = vadd.f32 %v943_v52, %v922_v12  ;;  %v1005_v51 = vpop.f32.mrf.mxu0 }
 0x77f   :  { %v946_v19 = vadd.f32 %v944_v4, %v2068_v20 }
 0x781   :  { %1267 = vtanh.f32 %v946_v19 }
 0x782   :  { %v965_v47 = vpop.f32.mrf.mxu2 }
 0x787   :  { %v1268_v31 = vpop.eup %1267 }
 0x788   :  { %984 = vmatmul.f32.vlgmr.msra.gmra.mxu3 %v1268_v31  ;;  %1024 = vmatmul.f32.vlgmr.msrb.gmra.mxu1 %v1268_v31 }
 0x789   :  { %1134 = vmatpush.msra.mxu3 %v2411_v17 }
 0x78b   :  { %1135 = vmatpush.msra.mxu3 %v2415_v50 }
 0x78d   :  { %1136 = vmatpush.msra.mxu3 %v2419_v16 }
 0x78f   :  { %1137 = vmatpush.msra.mxu3 %v2423_v15  ;;  %v2882_v15 = vld [vmem:[#allocation24_spill] sm:$0xff] }
 0x791   :  { %1138 = vmatpush.msra.mxu3 %v2427_v33 }
 0x793   :  { %1139 = vmatpush.msra.mxu3 %v2431_v37 }
 0x795   :  { %1140 = vmatpush.msra.mxu3 %v2435_v41 }
 0x797   :  { %1141 = vmatpush.msra.mxu3 %v2555_v58 }
 0x799   :  { %1142 = vmatpush.msra.mxu3 %v2559_v59 }
 0x79b   :  { %1143 = vmatpush.msra.mxu3 %v2563_v61 }
 0x79d   :  { %1144 = vmatpush.msra.mxu3 %v2567_v63 }
 0x79f   :  { %1145 = vmatpush.msra.mxu3 %v2571_v56 }
 0x7a1   :  { %1146 = vmatpush.msra.mxu3 %v2575_v2 }
 0x7a3   :  { %1147 = vmatpush.msra.mxu3 %v2579_v3 }
 0x7a5   :  { %1148 = vmatpush.msra.mxu3 %v2583_v6 }
 0x7a7   :  { %1149 = vmatpush.msra.mxu3 %v2587_v9 }
 0x805   :  { %v1025_v48 = vpop.f32.mrf.mxu1 }
 0x806   :  { %v1026_v53 = vadd.f32 %v1025_v48, %v1005_v51 }
 0x80b   :  { %v985_v30 = vpop.f32.mrf.mxu3 }
 0x80c   :  { %v986_v32 = vadd.f32 %v985_v30, %v965_v47 }
 0x80e   :  { %v1028_v40 = vadd.f32 %v986_v32, %v2881_v36 }
 0x810   :  { %1269 = vtanh.f32 %v1028_v40 }
 0x816   :  { %v1270_v45 = vpop.eup %1269 }
 0x817   :  { %1046 = vmatmul.f32.vlgmr.msrb.gmra.mxu2 %v1270_v45  ;;  %1068 = vmatmul.f32.vlgmr.msrb.gmra.mxu3 %v1270_v45 }
 0x818   :  { %1108 = vmatmul.f32.vlgmr.msra.gmra.mxu1 %v1270_v45 }
 0x895   :  { %v1109_v23 = vpop.f32.mrf.mxu1 }
 0x89a   :  { %v1047_v57 = vpop.f32.mrf.mxu2  ;;  %v1069_v17 = vpop.f32.mrf.mxu3 }
 0x89b   :  { %v1048_v0 = vadd.f32 %v1047_v57, %v1026_v53 }
 0x89d   :  { %v1050_v14 = vadd.f32 %v1048_v0, %v2068_v20 }
 0x89f   :  { %1271 = vtanh.f32 %v1050_v14 }
 0x8a5   :  { %v1272_v13 = vpop.eup %1271 }
 0x8a6   :  { %1088 = vmatmul.f32.vlgmr.msra.gmra.mxu0 %v1272_v13  ;;  %1128 = vmatmul.f32.vlgmr.msra.gmra.mxu2 %v1272_v13 }
 0x923   :  { %v1089_v50 = vpop.f32.mrf.mxu0 }
 0x924   :  { %v1090_v16 = vadd.f32 %v1089_v50, %v1069_v17 }
 0x926   :  { %v1132_v33 = vadd.f32 %v1090_v16, %v2882_v15 }
 0x928   :  { %1273 = vtanh.f32 %v1132_v33 }
 0x929   :  { %v1129_v41 = vpop.f32.mrf.mxu2 }
 0x92a   :  { %v1130_v25 = vadd.f32 %v1129_v41, %v1109_v23 }
 0x92e   :  { %v1274_v37 = vpop.eup %1273 }
 0x92f   :  { %1150 = vmatmul.f32.vlgmr.msra.gmra.mxu3 %v1274_v37 }
 0x9b2   :  { %v1151_v27 = vpop.f32.mrf.mxu3 }
 0x9b3   :  { %v1152_v38 = vadd.f32 %v1151_v27, %v1130_v25 }
 0x9b5   :  { %v1154_v43 = vadd.f32 %v1152_v38, %v2068_v20 }
 0x9b7   :  { %1275 = vtanh.f32 %v1154_v43 }
 0x9bd   :  { %v1276_v55 = vpop.eup %1275 }
 0x9be   :  { %1434 = dma.done.wait [#allocation5 + $0x2], 2048 }
 0x9bf   :  { %1435 = vsyncadd [#allocation5 + $0x2], 4294965248  ;;  %v1173_v24 = vld [vmem:[#allocation4 + $0x78] sm:$0xff]  ;;  %v1172_v22 = vld [vmem:[#allocation4 + $0x70] sm:$0xff] }
 0x9c0   :  { %1178 = vmatpush.msrb.mxu0 %v1173_v24  ;;  %v1171_v60 = vld [vmem:[#allocation4 + $0x68] sm:$0xff]  ;;  %v1170_v44 = vld [vmem:[#allocation4 + $0x60] sm:$0xff]  ;;  %v1169_v49 = vld [vmem:[#allocation4 + $0x58] sm:$0xff] }
 0x9c1   :  { %v1168_v10 = vld [vmem:[#allocation4 + $0x50] sm:$0xff]  ;;  %v1167_v26 = vld [vmem:[#allocation4 + $0x48] sm:$0xff]  ;;  %v1166_v1 = vld [vmem:[#allocation4 + $0x40] sm:$0xff] }
 0x9c2   :  { %1179 = vmatpush.msrb.mxu0 %v1172_v22  ;;  %v1165_v20 = vld [vmem:[#allocation4 + $0x38] sm:$0xff]  ;;  %v1164_v21 = vld [vmem:[#allocation4 + $0x30] sm:$0xff]  ;;  %v1163_v11 = vld [vmem:[#allocation4 + $0x28] sm:$0xff] }
 0x9c3   :  { %v1162_v35 = vld [vmem:[#allocation4 + $0x20] sm:$0xff]  ;;  %v1161_v46 = vld [vmem:[#allocation4 + $0x18] sm:$0xff]  ;;  %v1160_v34 = vld [vmem:[#allocation4 + $0x10] sm:$0xff] }
 0x9c4   :  { %1180 = vmatpush.msrb.mxu0 %v1171_v60  ;;  %v1159_v54 = vld [vmem:[#allocation4 + $0x8] sm:$0xff]  ;;  %v1158_v58 = vld [vmem:[#allocation4] sm:$0xff] }
 0x9c5   :  { %v1357_v59 = vld [vmem:[%s2656_s4] ss:$0 sm:$0xff] }
 0x9c6   :  { %1181 = vmatpush.msrb.mxu0 %v1170_v44 }
 0x9c8   :  { %1182 = vmatpush.msrb.mxu0 %v1169_v49 }
 0x9ca   :  { %1183 = vmatpush.msrb.mxu0 %v1168_v10 }
 0x9cc   :  { %1184 = vmatpush.msrb.mxu0 %v1167_v26 }
 0x9ce   :  { %1185 = vmatpush.msrb.mxu0 %v1166_v1 }
 0x9d0   :  { %1186 = vmatpush.msrb.mxu0 %v1165_v20 }
 0x9d2   :  { %1187 = vmatpush.msrb.mxu0 %v1164_v21 }
 0x9d4   :  { %1188 = vmatpush.msrb.mxu0 %v1163_v11 }
 0x9d6   :  { %1189 = vmatpush.msrb.mxu0 %v1162_v35 }
 0x9d8   :  { %1190 = vmatpush.msrb.mxu0 %v1161_v46 }
 0x9da   :  { %1191 = vmatpush.msrb.mxu0 %v1160_v34 }
 0x9dc   :  { %1192 = vmatpush.msrb.mxu0 %v1159_v54 }
 0x9de   :  { %1193 = vmatpush.msrb.mxu0 %v1158_v58 }
 0x9df   :  { %1194 = vmatmul.f32.vlgmr.msrb.gmra.mxu0 %v1276_v55 }
 0xa5c   :  { %v1195_v61 = vpop.f32.mrf.mxu0 }
 0xa5d   :  { %v1196_v63 = vadd.f32 %v1357_v59, %v1195_v61 }
 0xa5f   :  { %1198 = vst [vmem:[%s2657_s8] sm:$0xff] %v1196_v63 }
 0xa60   :  { %1203 = vsyncmov [#allocation5] }
 0xa63   :  { %s1204_s28 = vpop.sfrf %1203 }
 0xa64   :  { %p1237_p0 = scmp.ne.s32.totalorder %s1204_s28, 0 }
 0xa66   :  { %1208 = shalt.err (%p1237_p0)  }
 0xa67   :  { %1210 = vsyncmov [#allocation5 + $0x1] }
 0xa6a   :  { %s1211_s1 = vpop.sfrf %1210 }
 0xa6b   :  { %p1238_p1 = scmp.ne.s32.totalorder %s1211_s1, 0 }
 0xa6d   :  { %1215 = shalt.err (%p1238_p1)  }
 0xa6e   :  { %1217 = vsyncmov [#allocation5 + $0x2] }
 0xa71   :  { %s1218_s29 = vpop.sfrf %1217 }
 0xa72   :  { %p1239_p2 = scmp.ne.s32.totalorder %s1218_s29, 0 }
 0xa74   :  { %1222 = shalt.err (%p1239_p2)  }

</bundles_post_ra>
